<compile_context>
chip_gen: v7x
topology: tpu7x:2x2x1
jax: 0.10.0
libtpu: 0.0.40
codegen_flags: <defaults>
</compile_context>

<pallas_src>
import functools

import jax
import jax.numpy as jnp
from jax import lax
from jax.experimental import pallas as pl
from jax.experimental.pallas import tpu as pltpu


def _cin_kernel(feat_ref, *refs, feature_numb, head_num, depth,
                tile_chunks, chunk, compute_dtype):
    """One grid step processes `tile_chunks` batch chunks of `chunk` lanes each.

    feat_ref      : VMEM (tile_chunks, F, D, chunk)   -- batch on the lane axis
    refs[:depth]  : SMEM flat conv weights, weights[t].reshape(-1), index = h*P*F + i*F + m
    refs[depth]   : SMEM (depth*H,) conv biases (concatenated over depth)
    refs[depth+1] : SMEM (depth*H,) final linear weights
    refs[depth+2] : VMEM output (tile_chunks, 1, chunk)
    """
    M = feature_numb
    H = head_num

    w_refs = refs[:depth]
    bias_ref = refs[depth]
    lin_ref = refs[depth + 1]
    out_ref = refs[depth + 2]

    # ---- Hoist every SMEM scalar read: one load per scalar per grid step, reused across
    # all chunks / uses (JAX does not CSE repeated SMEM loads + broadcasts).
    w_vals = []
    for t in range(depth):
        P = M if t == 0 else H
        wref = w_refs[t]
        w_vals.append(
            [[[wref[h * P * M + i * M + m].astype(compute_dtype) for m in range(M)]
              for i in range(P)] for h in range(H)])
    bias_vals = [[bias_ref[t * H + h].astype(compute_dtype) for h in range(H)]
                 for t in range(depth)]
    lin_vals = [[lin_ref[t * H + h] for h in range(H)] for t in range(depth)]

    def process_chunk(c):
        # (F, D, chunk): each field slab x[m] is a lane-dense (D, chunk) tile.
        x = feat_ref[c].astype(compute_dtype)
        feat_rows = [x[m] for m in range(M)]
        x1_rows = feat_rows                       # x^0 = feature
        out_acc = jnp.zeros((1, chunk), jnp.float32)

        for t in range(depth):
            P = M if t == 0 else H
            Wt = w_vals[t]
            new_rows = []
            for h in range(H):
                if t == 0:
                    # acc = sum_m feat[m] * (sum_i W[h,i,m] * x1[i])
                    acc = None
                    for m in range(M):
                        tmp = Wt[h][0][m] * x1_rows[0]
                        for i in range(1, P):
                            tmp = tmp + Wt[h][i][m] * x1_rows[i]
                        term = feat_rows[m] * tmp
                        acc = term if acc is None else acc + term
                else:
                    # P = H < F: cheaper as u[i] = sum_m W[h,i,m]*feat[m]; acc = sum_i x1[i]*u[i]
                    acc = None
                    for i in range(P):
                        u = Wt[h][i][0] * feat_rows[0]
                        for m in range(1, M):
                            u = u + Wt[h][i][m] * feat_rows[m]
                        term = x1_rows[i] * u
                        acc = term if acc is None else acc + term
                acc = acc + bias_vals[t][h]            # Conv1d bias
                new_rows.append(acc)
                # torch.sum(x1, dim=2): sublane (XLU) reduction over D, accumulated in f32,
                # immediately weighted by the matching final-linear scalar.
                s = jnp.sum(acc.astype(jnp.float32), axis=0, keepdims=True)   # (1, chunk)
                out_acc = out_acc + lin_vals[t][h] * s
            x1_rows = new_rows

        out_ref[c] = out_acc.astype(out_ref.dtype)

    if tile_chunks == 1:
        process_chunk(0)
    else:
        # fori_loop (not an unrolled python loop) so only one chunk's slabs are live at a time.
        def body(c, carry):
            process_chunk(c)
            return carry
        lax.fori_loop(0, tile_chunks, body, 0)


def cin_layer_forward(feature, weights, biases, linear, *, head_num, depth,
                      chunk=128, tile_chunks=8,
                      compute_dtype=jnp.float32, input_dtype=None):
    """feature: (B, F, D). weights[t]: (H, P_t, F). biases[t]: (H,). linear: (depth*H, 1).
    Returns (B, 1) float32."""
    B, M, D = feature.shape
    H = head_num
    if input_dtype is None:
        input_dtype = compute_dtype

    # ---- batch tiling: batch lives on the lane axis in chunks of `chunk` lanes.
    if B <= chunk:
        chunk = B              # single chunk == full last dim -> no (8,128) constraint
        tile_chunks = 1
        n_chunks = 1
    else:
        n_chunks = -(-B // chunk)
        tile_chunks = min(tile_chunks, n_chunks)
        n_chunks = -(-n_chunks // tile_chunks) * tile_chunks
    b_pad = n_chunks * chunk
    grid = (n_chunks // tile_chunks,)

    x = feature.astype(input_dtype)
    if b_pad != B:
        x = jnp.pad(x, ((0, b_pad - B), (0, 0), (0, 0)))
    # (B_pad, F, D) -> (n_chunks, chunk, F, D) -> (n_chunks, F, D, chunk): lane-dense slabs.
    x = x.reshape(n_chunks, chunk, M, D).transpose(0, 2, 3, 1)

    w_flat = [jnp.asarray(w, jnp.float32).reshape(-1) for w in weights]
    bias_flat = jnp.concatenate([jnp.asarray(b, jnp.float32).reshape(-1) for b in biases])
    lin_flat = jnp.asarray(linear, jnp.float32).reshape(-1)

    kernel = functools.partial(
        _cin_kernel, feature_numb=M, head_num=H, depth=depth,
        tile_chunks=tile_chunks, chunk=chunk, compute_dtype=compute_dtype)

    smem_spec = pl.BlockSpec(memory_space=pltpu.MemorySpace.SMEM)
    in_spec = pl.BlockSpec((tile_chunks, M, D, chunk), lambda b: (b, 0, 0, 0))
    out_spec = pl.BlockSpec((tile_chunks, 1, chunk), lambda b: (b, 0, 0))

    itemsize = jnp.dtype(input_dtype).itemsize
    in_block_bytes = tile_chunks * M * D * chunk * itemsize
    out_block_bytes = tile_chunks * chunk * 4
    vmem_limit = int(min(max(4 * (in_block_bytes + out_block_bytes) + (4 << 20), 16 << 20),
                         64 << 20))

    flops_per_b = 0
    for t in range(depth):
        P = M if t == 0 else H
        flops_per_b += 2 * H * P * M * D      # CIN contraction FMAs
        flops_per_b += 2 * H * D + 2 * H      # bias add + D-sum + final linear
    cost = pl.CostEstimate(
        flops=int(b_pad * flops_per_b),
        transcendentals=0,
        bytes_accessed=int(int(x.size) * itemsize + b_pad * 4
                           + 4 * (sum(int(w.size) for w in w_flat)
                                  + int(bias_flat.size) + int(lin_flat.size))),
    )

    out = pl.pallas_call(
        kernel,
        out_shape=jax.ShapeDtypeStruct((n_chunks, 1, chunk), jnp.float32),
        grid_spec=pltpu.PrefetchScalarGridSpec(
            num_scalar_prefetch=0,
            grid=grid,
            in_specs=[in_spec] + [smem_spec] * (depth + 2),
            out_specs=out_spec,
        ),
        compiler_params=pltpu.CompilerParams(
            dimension_semantics=("parallel",),   # batch tiles independent -> megacore on v7x
            vmem_limit_bytes=vmem_limit,
        ),
        cost_estimate=cost,
    )(x, *w_flat, bias_flat, lin_flat)

    return out.reshape(b_pad)[:B].reshape(B, 1)


def cin_layer_reference(feature, weights, biases, linear, *, head_num, depth):
    """Pure-JAX reference mirroring the PyTorch forward."""
    B, M, D = feature.shape
    x1 = feature
    results = []
    for t in range(depth):
        P = x1.shape[1]
        z = x1[:, :, None, :] * feature[:, None, :, :]          # (B, P, M, D)
        z = z.reshape(B, P * M, D)
        W = weights[t].reshape(head_num, P * M)
        x1 = jnp.einsum("hc,bcd->bhd", W, z) + biases[t][None, :, None]
        results.append(jnp.sum(x1, axis=2, keepdims=True))      # (B, H, 1)
    res = jnp.concatenate(results, axis=1)                      # (B, depth*H, 1)
    out = jnp.swapaxes(res, 1, 2) @ linear[None, :, :]          # (B, 1, 1)
    return out[:, 0, :]                                         # squeeze(1) -> (B, 1)


if __name__ == "__main__":
    # Small shapes consistent with the module.
    batch = 2
    feature_numb = 4   # number of feature fields
    embed_size = 32    # embedding size
    head_num = 2
    depth = 3

    key = jax.random.PRNGKey(0)
    keys = jax.random.split(key, 2 * depth + 2)

    feature = jax.random.normal(keys[0], (batch, feature_numb, embed_size), jnp.float32)

    weights, biases = [], []
    for t in range(depth):
        P = feature_numb if t == 0 else head_num
        weights.append(
            0.1 * jax.random.normal(keys[1 + 2 * t], (head_num, P, feature_numb), jnp.float32))
        biases.append(0.1 * jax.random.normal(keys[2 + 2 * t], (head_num,), jnp.float32))
    # nn.init.normal(self.linear, mean=0, std=0.01)
    linear = 0.01 * jax.random.normal(keys[-1], (head_num * depth, 1), jnp.float32)

    # --- tiny batch (single chunk / single grid step), strict check
    out = cin_layer_forward(feature, weights, biases, linear, head_num=head_num, depth=depth)
    out = jax.block_until_ready(out)
    ref = cin_layer_reference(feature, weights, biases, linear, head_num=head_num, depth=depth)
    assert out.shape == (batch, 1), out.shape
    assert jnp.allclose(out, ref, atol=1e-5, rtol=1e-5), (out, ref)

    # --- larger batch: exercises the batch grid, lane-dense chunking and the fori_loop path
    big_b = 2048
    feature_big = jax.random.normal(jax.random.PRNGKey(1),
                                    (big_b, feature_numb, embed_size), jnp.float32)
    out_big = cin_layer_forward(feature_big, weights, biases, linear,
                                head_num=head_num, depth=depth)
    out_big = jax.block_until_ready(out_big)
    ref_big = cin_layer_reference(feature_big, weights, biases, linear,
                                  head_num=head_num, depth=depth)
    assert out_big.shape == (big_b, 1), out_big.shape
    assert jnp.allclose(out_big, ref_big, atol=1e-4, rtol=1e-3), "big-batch mismatch"

    # --- bf16 compute path (v6e/v7x-style); f32 D-sum/output accumulation, loose check
    out_bf16 = cin_layer_forward(feature_big, weights, biases, linear,
                                 head_num=head_num, depth=depth,
                                 compute_dtype=jnp.bfloat16)
    out_bf16 = jax.block_until_ready(out_bf16)
    err = float(jnp.max(jnp.abs(out_bf16.astype(jnp.float32) - ref_big)))
    scale = float(jnp.max(jnp.abs(ref_big)))
    assert err < 0.1 * (1.0 + scale), (err, scale)

    print("KERNEL_OK")
</pallas_src>

<mosaic_0001>
module attributes {stable_mosaic.version = 11 : i64} {
  func.func @_cin_kernel(%arg0: i32, %arg1: memref<1x4x32x2xf32, #tpu.memory_space<vmem>>, %arg2: memref<32xf32, #tpu.memory_space<smem>>, %arg3: memref<16xf32, #tpu.memory_space<smem>>, %arg4: memref<16xf32, #tpu.memory_space<smem>>, %arg5: memref<6xf32, #tpu.memory_space<smem>>, %arg6: memref<6xf32, #tpu.memory_space<smem>>, %arg7: memref<1x1x2xf32, #tpu.memory_space<vmem>>) attributes {dimension_semantics = [#tpu.dimension_semantics<parallel>], iteration_bounds = array<i64: 1>, scalar_prefetch = 0 : i64, scratch_operands = 0 : i64, tpu.core_type = #tpu.core_type<tc>, window_params = [{transform_indices = @transform_0, window_bounds = array<i64: 1, 4, 32, 2>}, {transform_indices = @transform_1, window_bounds = array<i64: 32>}, {transform_indices = @transform_2, window_bounds = array<i64: 16>}, {transform_indices = @transform_3, window_bounds = array<i64: 16>}, {transform_indices = @transform_4, window_bounds = array<i64: 6>}, {transform_indices = @transform_5, window_bounds = array<i64: 6>}, {transform_indices = @transform_6, window_bounds = array<i64: 1, 1, 2>}]} {
    %c0 = arith.constant 0 : index
    %0 = memref.load %arg2[%c0] : memref<32xf32, #tpu.memory_space<smem>>
    %c1 = arith.constant 1 : index
    %1 = memref.load %arg2[%c1] : memref<32xf32, #tpu.memory_space<smem>>
    %c2 = arith.constant 2 : index
    %2 = memref.load %arg2[%c2] : memref<32xf32, #tpu.memory_space<smem>>
    %c3 = arith.constant 3 : index
    %3 = memref.load %arg2[%c3] : memref<32xf32, #tpu.memory_space<smem>>
    %c4 = arith.constant 4 : index
    %4 = memref.load %arg2[%c4] : memref<32xf32, #tpu.memory_space<smem>>
    %c5 = arith.constant 5 : index
    %5 = memref.load %arg2[%c5] : memref<32xf32, #tpu.memory_space<smem>>
    %c6 = arith.constant 6 : index
    %6 = memref.load %arg2[%c6] : memref<32xf32, #tpu.memory_space<smem>>
    %c7 = arith.constant 7 : index
    %7 = memref.load %arg2[%c7] : memref<32xf32, #tpu.memory_space<smem>>
    %c8 = arith.constant 8 : index
    %8 = memref.load %arg2[%c8] : memref<32xf32, #tpu.memory_space<smem>>
    %c9 = arith.constant 9 : index
    %9 = memref.load %arg2[%c9] : memref<32xf32, #tpu.memory_space<smem>>
    %c10 = arith.constant 10 : index
    %10 = memref.load %arg2[%c10] : memref<32xf32, #tpu.memory_space<smem>>
    %c11 = arith.constant 11 : index
    %11 = memref.load %arg2[%c11] : memref<32xf32, #tpu.memory_space<smem>>
    %c12 = arith.constant 12 : index
    %12 = memref.load %arg2[%c12] : memref<32xf32, #tpu.memory_space<smem>>
    %c13 = arith.constant 13 : index
    %13 = memref.load %arg2[%c13] : memref<32xf32, #tpu.memory_space<smem>>
    %c14 = arith.constant 14 : index
    %14 = memref.load %arg2[%c14] : memref<32xf32, #tpu.memory_space<smem>>
    %c15 = arith.constant 15 : index
    %15 = memref.load %arg2[%c15] : memref<32xf32, #tpu.memory_space<smem>>
    %c16 = arith.constant 16 : index
    %16 = memref.load %arg2[%c16] : memref<32xf32, #tpu.memory_space<smem>>
    %c17 = arith.constant 17 : index
    %17 = memref.load %arg2[%c17] : memref<32xf32, #tpu.memory_space<smem>>
    %c18 = arith.constant 18 : index
    %18 = memref.load %arg2[%c18] : memref<32xf32, #tpu.memory_space<smem>>
    %c19 = arith.constant 19 : index
    %19 = memref.load %arg2[%c19] : memref<32xf32, #tpu.memory_space<smem>>
    %c20 = arith.constant 20 : index
    %20 = memref.load %arg2[%c20] : memref<32xf32, #tpu.memory_space<smem>>
    %c21 = arith.constant 21 : index
    %21 = memref.load %arg2[%c21] : memref<32xf32, #tpu.memory_space<smem>>
    %c22 = arith.constant 22 : index
    %22 = memref.load %arg2[%c22] : memref<32xf32, #tpu.memory_space<smem>>
    %c23 = arith.constant 23 : index
    %23 = memref.load %arg2[%c23] : memref<32xf32, #tpu.memory_space<smem>>
    %c24 = arith.constant 24 : index
    %24 = memref.load %arg2[%c24] : memref<32xf32, #tpu.memory_space<smem>>
    %c25 = arith.constant 25 : index
    %25 = memref.load %arg2[%c25] : memref<32xf32, #tpu.memory_space<smem>>
    %c26 = arith.constant 26 : index
    %26 = memref.load %arg2[%c26] : memref<32xf32, #tpu.memory_space<smem>>
    %c27 = arith.constant 27 : index
    %27 = memref.load %arg2[%c27] : memref<32xf32, #tpu.memory_space<smem>>
    %c28 = arith.constant 28 : index
    %28 = memref.load %arg2[%c28] : memref<32xf32, #tpu.memory_space<smem>>
    %c29 = arith.constant 29 : index
    %29 = memref.load %arg2[%c29] : memref<32xf32, #tpu.memory_space<smem>>
    %c30 = arith.constant 30 : index
    %30 = memref.load %arg2[%c30] : memref<32xf32, #tpu.memory_space<smem>>
    %c31 = arith.constant 31 : index
    %31 = memref.load %arg2[%c31] : memref<32xf32, #tpu.memory_space<smem>>
    %c0_0 = arith.constant 0 : index
    %32 = memref.load %arg3[%c0_0] : memref<16xf32, #tpu.memory_space<smem>>
    %c1_1 = arith.constant 1 : index
    %33 = memref.load %arg3[%c1_1] : memref<16xf32, #tpu.memory_space<smem>>
    %c2_2 = arith.constant 2 : index
    %34 = memref.load %arg3[%c2_2] : memref<16xf32, #tpu.memory_space<smem>>
    %c3_3 = arith.constant 3 : index
    %35 = memref.load %arg3[%c3_3] : memref<16xf32, #tpu.memory_space<smem>>
    %c4_4 = arith.constant 4 : index
    %36 = memref.load %arg3[%c4_4] : memref<16xf32, #tpu.memory_space<smem>>
    %c5_5 = arith.constant 5 : index
    %37 = memref.load %arg3[%c5_5] : memref<16xf32, #tpu.memory_space<smem>>
    %c6_6 = arith.constant 6 : index
    %38 = memref.load %arg3[%c6_6] : memref<16xf32, #tpu.memory_space<smem>>
    %c7_7 = arith.constant 7 : index
    %39 = memref.load %arg3[%c7_7] : memref<16xf32, #tpu.memory_space<smem>>
    %c8_8 = arith.constant 8 : index
    %40 = memref.load %arg3[%c8_8] : memref<16xf32, #tpu.memory_space<smem>>
    %c9_9 = arith.constant 9 : index
    %41 = memref.load %arg3[%c9_9] : memref<16xf32, #tpu.memory_space<smem>>
    %c10_10 = arith.constant 10 : index
    %42 = memref.load %arg3[%c10_10] : memref<16xf32, #tpu.memory_space<smem>>
    %c11_11 = arith.constant 11 : index
    %43 = memref.load %arg3[%c11_11] : memref<16xf32, #tpu.memory_space<smem>>
    %c12_12 = arith.constant 12 : index
    %44 = memref.load %arg3[%c12_12] : memref<16xf32, #tpu.memory_space<smem>>
    %c13_13 = arith.constant 13 : index
    %45 = memref.load %arg3[%c13_13] : memref<16xf32, #tpu.memory_space<smem>>
    %c14_14 = arith.constant 14 : index
    %46 = memref.load %arg3[%c14_14] : memref<16xf32, #tpu.memory_space<smem>>
    %c15_15 = arith.constant 15 : index
    %47 = memref.load %arg3[%c15_15] : memref<16xf32, #tpu.memory_space<smem>>
    %c0_16 = arith.constant 0 : index
    %48 = memref.load %arg4[%c0_16] : memref<16xf32, #tpu.memory_space<smem>>
    %c1_17 = arith.constant 1 : index
    %49 = memref.load %arg4[%c1_17] : memref<16xf32, #tpu.memory_space<smem>>
    %c2_18 = arith.constant 2 : index
    %50 = memref.load %arg4[%c2_18] : memref<16xf32, #tpu.memory_space<smem>>
    %c3_19 = arith.constant 3 : index
    %51 = memref.load %arg4[%c3_19] : memref<16xf32, #tpu.memory_space<smem>>
    %c4_20 = arith.constant 4 : index
    %52 = memref.load %arg4[%c4_20] : memref<16xf32, #tpu.memory_space<smem>>
    %c5_21 = arith.constant 5 : index
    %53 = memref.load %arg4[%c5_21] : memref<16xf32, #tpu.memory_space<smem>>
    %c6_22 = arith.constant 6 : index
    %54 = memref.load %arg4[%c6_22] : memref<16xf32, #tpu.memory_space<smem>>
    %c7_23 = arith.constant 7 : index
    %55 = memref.load %arg4[%c7_23] : memref<16xf32, #tpu.memory_space<smem>>
    %c8_24 = arith.constant 8 : index
    %56 = memref.load %arg4[%c8_24] : memref<16xf32, #tpu.memory_space<smem>>
    %c9_25 = arith.constant 9 : index
    %57 = memref.load %arg4[%c9_25] : memref<16xf32, #tpu.memory_space<smem>>
    %c10_26 = arith.constant 10 : index
    %58 = memref.load %arg4[%c10_26] : memref<16xf32, #tpu.memory_space<smem>>
    %c11_27 = arith.constant 11 : index
    %59 = memref.load %arg4[%c11_27] : memref<16xf32, #tpu.memory_space<smem>>
    %c12_28 = arith.constant 12 : index
    %60 = memref.load %arg4[%c12_28] : memref<16xf32, #tpu.memory_space<smem>>
    %c13_29 = arith.constant 13 : index
    %61 = memref.load %arg4[%c13_29] : memref<16xf32, #tpu.memory_space<smem>>
    %c14_30 = arith.constant 14 : index
    %62 = memref.load %arg4[%c14_30] : memref<16xf32, #tpu.memory_space<smem>>
    %c15_31 = arith.constant 15 : index
    %63 = memref.load %arg4[%c15_31] : memref<16xf32, #tpu.memory_space<smem>>
    %c0_32 = arith.constant 0 : index
    %64 = memref.load %arg5[%c0_32] : memref<6xf32, #tpu.memory_space<smem>>
    %c1_33 = arith.constant 1 : index
    %65 = memref.load %arg5[%c1_33] : memref<6xf32, #tpu.memory_space<smem>>
    %c2_34 = arith.constant 2 : index
    %66 = memref.load %arg5[%c2_34] : memref<6xf32, #tpu.memory_space<smem>>
    %c3_35 = arith.constant 3 : index
    %67 = memref.load %arg5[%c3_35] : memref<6xf32, #tpu.memory_space<smem>>
    %c4_36 = arith.constant 4 : index
    %68 = memref.load %arg5[%c4_36] : memref<6xf32, #tpu.memory_space<smem>>
    %c5_37 = arith.constant 5 : index
    %69 = memref.load %arg5[%c5_37] : memref<6xf32, #tpu.memory_space<smem>>
    %c0_38 = arith.constant 0 : index
    %70 = memref.load %arg6[%c0_38] : memref<6xf32, #tpu.memory_space<smem>>
    %c1_39 = arith.constant 1 : index
    %71 = memref.load %arg6[%c1_39] : memref<6xf32, #tpu.memory_space<smem>>
    %c2_40 = arith.constant 2 : index
    %72 = memref.load %arg6[%c2_40] : memref<6xf32, #tpu.memory_space<smem>>
    %c3_41 = arith.constant 3 : index
    %73 = memref.load %arg6[%c3_41] : memref<6xf32, #tpu.memory_space<smem>>
    %c4_42 = arith.constant 4 : index
    %74 = memref.load %arg6[%c4_42] : memref<6xf32, #tpu.memory_space<smem>>
    %c5_43 = arith.constant 5 : index
    %75 = memref.load %arg6[%c5_43] : memref<6xf32, #tpu.memory_space<smem>>
    %c0_44 = arith.constant 0 : index
    %c0_45 = arith.constant 0 : index
    %c0_46 = arith.constant 0 : index
    %c0_47 = arith.constant 0 : index
    %76 = vector.load %arg1[%c0_44, %c0_45, %c0_46, %c0_47] : memref<1x4x32x2xf32, #tpu.memory_space<vmem>>, vector<1x4x32x2xf32>
    %77 = vector.shape_cast %76 : vector<1x4x32x2xf32> to vector<4x32x2xf32>
    %78 = vector.extract_strided_slice %77 {offsets = [0, 0, 0], sizes = [1, 32, 2], strides = [1, 1, 1]} : vector<4x32x2xf32> to vector<1x32x2xf32>
    %79 = vector.shape_cast %78 : vector<1x32x2xf32> to vector<32x2xf32>
    %80 = vector.extract_strided_slice %77 {offsets = [1, 0, 0], sizes = [1, 32, 2], strides = [1, 1, 1]} : vector<4x32x2xf32> to vector<1x32x2xf32>
    %81 = vector.shape_cast %80 : vector<1x32x2xf32> to vector<32x2xf32>
    %82 = vector.extract_strided_slice %77 {offsets = [2, 0, 0], sizes = [1, 32, 2], strides = [1, 1, 1]} : vector<4x32x2xf32> to vector<1x32x2xf32>
    %83 = vector.shape_cast %82 : vector<1x32x2xf32> to vector<32x2xf32>
    %84 = vector.extract_strided_slice %77 {offsets = [3, 0, 0], sizes = [1, 32, 2], strides = [1, 1, 1]} : vector<4x32x2xf32> to vector<1x32x2xf32>
    %85 = vector.shape_cast %84 : vector<1x32x2xf32> to vector<32x2xf32>
    %cst = arith.constant 0.000000e+00 : f32
    %86 = vector.broadcast %cst : f32 to vector<1x2xf32>
    %87 = vector.broadcast %0 : f32 to vector<32x2xf32>
    %88 = arith.mulf %87, %79 : vector<32x2xf32>
    %89 = vector.broadcast %4 : f32 to vector<32x2xf32>
    %90 = arith.mulf %89, %81 : vector<32x2xf32>
    %91 = arith.addf %88, %90 : vector<32x2xf32>
    %92 = vector.broadcast %8 : f32 to vector<32x2xf32>
    %93 = arith.mulf %92, %83 : vector<32x2xf32>
    %94 = arith.addf %91, %93 : vector<32x2xf32>
    %95 = vector.broadcast %12 : f32 to vector<32x2xf32>
    %96 = arith.mulf %95, %85 : vector<32x2xf32>
    %97 = arith.addf %94, %96 : vector<32x2xf32>
    %98 = arith.mulf %79, %97 : vector<32x2xf32>
    %99 = vector.broadcast %1 : f32 to vector<32x2xf32>
    %100 = arith.mulf %99, %79 : vector<32x2xf32>
    %101 = vector.broadcast %5 : f32 to vector<32x2xf32>
    %102 = arith.mulf %101, %81 : vector<32x2xf32>
    %103 = arith.addf %100, %102 : vector<32x2xf32>
    %104 = vector.broadcast %9 : f32 to vector<32x2xf32>
    %105 = arith.mulf %104, %83 : vector<32x2xf32>
    %106 = arith.addf %103, %105 : vector<32x2xf32>
    %107 = vector.broadcast %13 : f32 to vector<32x2xf32>
    %108 = arith.mulf %107, %85 : vector<32x2xf32>
    %109 = arith.addf %106, %108 : vector<32x2xf32>
    %110 = arith.mulf %81, %109 : vector<32x2xf32>
    %111 = arith.addf %98, %110 : vector<32x2xf32>
    %112 = vector.broadcast %2 : f32 to vector<32x2xf32>
    %113 = arith.mulf %112, %79 : vector<32x2xf32>
    %114 = vector.broadcast %6 : f32 to vector<32x2xf32>
    %115 = arith.mulf %114, %81 : vector<32x2xf32>
    %116 = arith.addf %113, %115 : vector<32x2xf32>
    %117 = vector.broadcast %10 : f32 to vector<32x2xf32>
    %118 = arith.mulf %117, %83 : vector<32x2xf32>
    %119 = arith.addf %116, %118 : vector<32x2xf32>
    %120 = vector.broadcast %14 : f32 to vector<32x2xf32>
    %121 = arith.mulf %120, %85 : vector<32x2xf32>
    %122 = arith.addf %119, %121 : vector<32x2xf32>
    %123 = arith.mulf %83, %122 : vector<32x2xf32>
    %124 = arith.addf %111, %123 : vector<32x2xf32>
    %125 = vector.broadcast %3 : f32 to vector<32x2xf32>
    %126 = arith.mulf %125, %79 : vector<32x2xf32>
    %127 = vector.broadcast %7 : f32 to vector<32x2xf32>
    %128 = arith.mulf %127, %81 : vector<32x2xf32>
    %129 = arith.addf %126, %128 : vector<32x2xf32>
    %130 = vector.broadcast %11 : f32 to vector<32x2xf32>
    %131 = arith.mulf %130, %83 : vector<32x2xf32>
    %132 = arith.addf %129, %131 : vector<32x2xf32>
    %133 = vector.broadcast %15 : f32 to vector<32x2xf32>
    %134 = arith.mulf %133, %85 : vector<32x2xf32>
    %135 = arith.addf %132, %134 : vector<32x2xf32>
    %136 = arith.mulf %85, %135 : vector<32x2xf32>
    %137 = arith.addf %124, %136 : vector<32x2xf32>
    %138 = vector.broadcast %64 : f32 to vector<32x2xf32>
    %139 = arith.addf %137, %138 : vector<32x2xf32>
    %cst_48 = arith.constant dense<0.000000e+00> : vector<2xf32>
    %140 = vector.multi_reduction <add>, %139, %cst_48 [0] : vector<32x2xf32> to vector<2xf32>
    %141 = vector.shape_cast %140 : vector<2xf32> to vector<1x2xf32>
    %142 = vector.broadcast %70 : f32 to vector<1x2xf32>
    %143 = arith.mulf %142, %141 : vector<1x2xf32>
    %144 = arith.addf %86, %143 : vector<1x2xf32>
    %145 = vector.broadcast %16 : f32 to vector<32x2xf32>
    %146 = arith.mulf %145, %79 : vector<32x2xf32>
    %147 = vector.broadcast %20 : f32 to vector<32x2xf32>
    %148 = arith.mulf %147, %81 : vector<32x2xf32>
    %149 = arith.addf %146, %148 : vector<32x2xf32>
    %150 = vector.broadcast %24 : f32 to vector<32x2xf32>
    %151 = arith.mulf %150, %83 : vector<32x2xf32>
    %152 = arith.addf %149, %151 : vector<32x2xf32>
    %153 = vector.broadcast %28 : f32 to vector<32x2xf32>
    %154 = arith.mulf %153, %85 : vector<32x2xf32>
    %155 = arith.addf %152, %154 : vector<32x2xf32>
    %156 = arith.mulf %79, %155 : vector<32x2xf32>
    %157 = vector.broadcast %17 : f32 to vector<32x2xf32>
    %158 = arith.mulf %157, %79 : vector<32x2xf32>
    %159 = vector.broadcast %21 : f32 to vector<32x2xf32>
    %160 = arith.mulf %159, %81 : vector<32x2xf32>
    %161 = arith.addf %158, %160 : vector<32x2xf32>
    %162 = vector.broadcast %25 : f32 to vector<32x2xf32>
    %163 = arith.mulf %162, %83 : vector<32x2xf32>
    %164 = arith.addf %161, %163 : vector<32x2xf32>
    %165 = vector.broadcast %29 : f32 to vector<32x2xf32>
    %166 = arith.mulf %165, %85 : vector<32x2xf32>
    %167 = arith.addf %164, %166 : vector<32x2xf32>
    %168 = arith.mulf %81, %167 : vector<32x2xf32>
    %169 = arith.addf %156, %168 : vector<32x2xf32>
    %170 = vector.broadcast %18 : f32 to vector<32x2xf32>
    %171 = arith.mulf %170, %79 : vector<32x2xf32>
    %172 = vector.broadcast %22 : f32 to vector<32x2xf32>
    %173 = arith.mulf %172, %81 : vector<32x2xf32>
    %174 = arith.addf %171, %173 : vector<32x2xf32>
    %175 = vector.broadcast %26 : f32 to vector<32x2xf32>
    %176 = arith.mulf %175, %83 : vector<32x2xf32>
    %177 = arith.addf %174, %176 : vector<32x2xf32>
    %178 = vector.broadcast %30 : f32 to vector<32x2xf32>
    %179 = arith.mulf %178, %85 : vector<32x2xf32>
    %180 = arith.addf %177, %179 : vector<32x2xf32>
    %181 = arith.mulf %83, %180 : vector<32x2xf32>
    %182 = arith.addf %169, %181 : vector<32x2xf32>
    %183 = vector.broadcast %19 : f32 to vector<32x2xf32>
    %184 = arith.mulf %183, %79 : vector<32x2xf32>
    %185 = vector.broadcast %23 : f32 to vector<32x2xf32>
    %186 = arith.mulf %185, %81 : vector<32x2xf32>
    %187 = arith.addf %184, %186 : vector<32x2xf32>
    %188 = vector.broadcast %27 : f32 to vector<32x2xf32>
    %189 = arith.mulf %188, %83 : vector<32x2xf32>
    %190 = arith.addf %187, %189 : vector<32x2xf32>
    %191 = vector.broadcast %31 : f32 to vector<32x2xf32>
    %192 = arith.mulf %191, %85 : vector<32x2xf32>
    %193 = arith.addf %190, %192 : vector<32x2xf32>
    %194 = arith.mulf %85, %193 : vector<32x2xf32>
    %195 = arith.addf %182, %194 : vector<32x2xf32>
    %196 = vector.broadcast %65 : f32 to vector<32x2xf32>
    %197 = arith.addf %195, %196 : vector<32x2xf32>
    %cst_49 = arith.constant dense<0.000000e+00> : vector<2xf32>
    %198 = vector.multi_reduction <add>, %197, %cst_49 [0] : vector<32x2xf32> to vector<2xf32>
    %199 = vector.shape_cast %198 : vector<2xf32> to vector<1x2xf32>
    %200 = vector.broadcast %71 : f32 to vector<1x2xf32>
    %201 = arith.mulf %200, %199 : vector<1x2xf32>
    %202 = arith.addf %144, %201 : vector<1x2xf32>
    %203 = vector.broadcast %32 : f32 to vector<32x2xf32>
    %204 = arith.mulf %203, %79 : vector<32x2xf32>
    %205 = vector.broadcast %33 : f32 to vector<32x2xf32>
    %206 = arith.mulf %205, %81 : vector<32x2xf32>
    %207 = arith.addf %204, %206 : vector<32x2xf32>
    %208 = vector.broadcast %34 : f32 to vector<32x2xf32>
    %209 = arith.mulf %208, %83 : vector<32x2xf32>
    %210 = arith.addf %207, %209 : vector<32x2xf32>
    %211 = vector.broadcast %35 : f32 to vector<32x2xf32>
    %212 = arith.mulf %211, %85 : vector<32x2xf32>
    %213 = arith.addf %210, %212 : vector<32x2xf32>
    %214 = arith.mulf %139, %213 : vector<32x2xf32>
    %215 = vector.broadcast %36 : f32 to vector<32x2xf32>
    %216 = arith.mulf %215, %79 : vector<32x2xf32>
    %217 = vector.broadcast %37 : f32 to vector<32x2xf32>
    %218 = arith.mulf %217, %81 : vector<32x2xf32>
    %219 = arith.addf %216, %218 : vector<32x2xf32>
    %220 = vector.broadcast %38 : f32 to vector<32x2xf32>
    %221 = arith.mulf %220, %83 : vector<32x2xf32>
    %222 = arith.addf %219, %221 : vector<32x2xf32>
    %223 = vector.broadcast %39 : f32 to vector<32x2xf32>
    %224 = arith.mulf %223, %85 : vector<32x2xf32>
    %225 = arith.addf %222, %224 : vector<32x2xf32>
    %226 = arith.mulf %197, %225 : vector<32x2xf32>
    %227 = arith.addf %214, %226 : vector<32x2xf32>
    %228 = vector.broadcast %66 : f32 to vector<32x2xf32>
    %229 = arith.addf %227, %228 : vector<32x2xf32>
    %cst_50 = arith.constant dense<0.000000e+00> : vector<2xf32>
    %230 = vector.multi_reduction <add>, %229, %cst_50 [0] : vector<32x2xf32> to vector<2xf32>
    %231 = vector.shape_cast %230 : vector<2xf32> to vector<1x2xf32>
    %232 = vector.broadcast %72 : f32 to vector<1x2xf32>
    %233 = arith.mulf %232, %231 : vector<1x2xf32>
    %234 = arith.addf %202, %233 : vector<1x2xf32>
    %235 = vector.broadcast %40 : f32 to vector<32x2xf32>
    %236 = arith.mulf %235, %79 : vector<32x2xf32>
    %237 = vector.broadcast %41 : f32 to vector<32x2xf32>
    %238 = arith.mulf %237, %81 : vector<32x2xf32>
    %239 = arith.addf %236, %238 : vector<32x2xf32>
    %240 = vector.broadcast %42 : f32 to vector<32x2xf32>
    %241 = arith.mulf %240, %83 : vector<32x2xf32>
    %242 = arith.addf %239, %241 : vector<32x2xf32>
    %243 = vector.broadcast %43 : f32 to vector<32x2xf32>
    %244 = arith.mulf %243, %85 : vector<32x2xf32>
    %245 = arith.addf %242, %244 : vector<32x2xf32>
    %246 = arith.mulf %139, %245 : vector<32x2xf32>
    %247 = vector.broadcast %44 : f32 to vector<32x2xf32>
    %248 = arith.mulf %247, %79 : vector<32x2xf32>
    %249 = vector.broadcast %45 : f32 to vector<32x2xf32>
    %250 = arith.mulf %249, %81 : vector<32x2xf32>
    %251 = arith.addf %248, %250 : vector<32x2xf32>
    %252 = vector.broadcast %46 : f32 to vector<32x2xf32>
    %253 = arith.mulf %252, %83 : vector<32x2xf32>
    %254 = arith.addf %251, %253 : vector<32x2xf32>
    %255 = vector.broadcast %47 : f32 to vector<32x2xf32>
    %256 = arith.mulf %255, %85 : vector<32x2xf32>
    %257 = arith.addf %254, %256 : vector<32x2xf32>
    %258 = arith.mulf %197, %257 : vector<32x2xf32>
    %259 = arith.addf %246, %258 : vector<32x2xf32>
    %260 = vector.broadcast %67 : f32 to vector<32x2xf32>
    %261 = arith.addf %259, %260 : vector<32x2xf32>
    %cst_51 = arith.constant dense<0.000000e+00> : vector<2xf32>
    %262 = vector.multi_reduction <add>, %261, %cst_51 [0] : vector<32x2xf32> to vector<2xf32>
    %263 = vector.shape_cast %262 : vector<2xf32> to vector<1x2xf32>
    %264 = vector.broadcast %73 : f32 to vector<1x2xf32>
    %265 = arith.mulf %264, %263 : vector<1x2xf32>
    %266 = arith.addf %234, %265 : vector<1x2xf32>
    %267 = vector.broadcast %48 : f32 to vector<32x2xf32>
    %268 = arith.mulf %267, %79 : vector<32x2xf32>
    %269 = vector.broadcast %49 : f32 to vector<32x2xf32>
    %270 = arith.mulf %269, %81 : vector<32x2xf32>
    %271 = arith.addf %268, %270 : vector<32x2xf32>
    %272 = vector.broadcast %50 : f32 to vector<32x2xf32>
    %273 = arith.mulf %272, %83 : vector<32x2xf32>
    %274 = arith.addf %271, %273 : vector<32x2xf32>
    %275 = vector.broadcast %51 : f32 to vector<32x2xf32>
    %276 = arith.mulf %275, %85 : vector<32x2xf32>
    %277 = arith.addf %274, %276 : vector<32x2xf32>
    %278 = arith.mulf %229, %277 : vector<32x2xf32>
    %279 = vector.broadcast %52 : f32 to vector<32x2xf32>
    %280 = arith.mulf %279, %79 : vector<32x2xf32>
    %281 = vector.broadcast %53 : f32 to vector<32x2xf32>
    %282 = arith.mulf %281, %81 : vector<32x2xf32>
    %283 = arith.addf %280, %282 : vector<32x2xf32>
    %284 = vector.broadcast %54 : f32 to vector<32x2xf32>
    %285 = arith.mulf %284, %83 : vector<32x2xf32>
    %286 = arith.addf %283, %285 : vector<32x2xf32>
    %287 = vector.broadcast %55 : f32 to vector<32x2xf32>
    %288 = arith.mulf %287, %85 : vector<32x2xf32>
    %289 = arith.addf %286, %288 : vector<32x2xf32>
    %290 = arith.mulf %261, %289 : vector<32x2xf32>
    %291 = arith.addf %278, %290 : vector<32x2xf32>
    %292 = vector.broadcast %68 : f32 to vector<32x2xf32>
    %293 = arith.addf %291, %292 : vector<32x2xf32>
    %cst_52 = arith.constant dense<0.000000e+00> : vector<2xf32>
    %294 = vector.multi_reduction <add>, %293, %cst_52 [0] : vector<32x2xf32> to vector<2xf32>
    %295 = vector.shape_cast %294 : vector<2xf32> to vector<1x2xf32>
    %296 = vector.broadcast %74 : f32 to vector<1x2xf32>
    %297 = arith.mulf %296, %295 : vector<1x2xf32>
    %298 = arith.addf %266, %297 : vector<1x2xf32>
    %299 = vector.broadcast %56 : f32 to vector<32x2xf32>
    %300 = arith.mulf %299, %79 : vector<32x2xf32>
    %301 = vector.broadcast %57 : f32 to vector<32x2xf32>
    %302 = arith.mulf %301, %81 : vector<32x2xf32>
    %303 = arith.addf %300, %302 : vector<32x2xf32>
    %304 = vector.broadcast %58 : f32 to vector<32x2xf32>
    %305 = arith.mulf %304, %83 : vector<32x2xf32>
    %306 = arith.addf %303, %305 : vector<32x2xf32>
    %307 = vector.broadcast %59 : f32 to vector<32x2xf32>
    %308 = arith.mulf %307, %85 : vector<32x2xf32>
    %309 = arith.addf %306, %308 : vector<32x2xf32>
    %310 = arith.mulf %229, %309 : vector<32x2xf32>
    %311 = vector.broadcast %60 : f32 to vector<32x2xf32>
    %312 = arith.mulf %311, %79 : vector<32x2xf32>
    %313 = vector.broadcast %61 : f32 to vector<32x2xf32>
    %314 = arith.mulf %313, %81 : vector<32x2xf32>
    %315 = arith.addf %312, %314 : vector<32x2xf32>
    %316 = vector.broadcast %62 : f32 to vector<32x2xf32>
    %317 = arith.mulf %316, %83 : vector<32x2xf32>
    %318 = arith.addf %315, %317 : vector<32x2xf32>
    %319 = vector.broadcast %63 : f32 to vector<32x2xf32>
    %320 = arith.mulf %319, %85 : vector<32x2xf32>
    %321 = arith.addf %318, %320 : vector<32x2xf32>
    %322 = arith.mulf %261, %321 : vector<32x2xf32>
    %323 = arith.addf %310, %322 : vector<32x2xf32>
    %324 = vector.broadcast %69 : f32 to vector<32x2xf32>
    %325 = arith.addf %323, %324 : vector<32x2xf32>
    %cst_53 = arith.constant dense<0.000000e+00> : vector<2xf32>
    %326 = vector.multi_reduction <add>, %325, %cst_53 [0] : vector<32x2xf32> to vector<2xf32>
    %327 = vector.shape_cast %326 : vector<2xf32> to vector<1x2xf32>
    %328 = vector.broadcast %75 : f32 to vector<1x2xf32>
    %329 = arith.mulf %328, %327 : vector<1x2xf32>
    %330 = arith.addf %298, %329 : vector<1x2xf32>
    %c0_54 = arith.constant 0 : index
    %c0_55 = arith.constant 0 : index
    %c0_56 = arith.constant 0 : index
    %331 = vector.load %arg7[%c0_54, %c0_55, %c0_56] : memref<1x1x2xf32, #tpu.memory_space<vmem>>, vector<1x1x2xf32>
    %332 = vector.shape_cast %331 : vector<1x1x2xf32> to vector<1x2xf32>
    %333 = vector.shape_cast %330 : vector<1x2xf32> to vector<1x1x2xf32>
    tpu.vector_store %arg7[%c0_54, %c0_55, %c0_56], %333 {strides = array<i32>} : memref<1x1x2xf32, #tpu.memory_space<vmem>>, vector<1x1x2xf32>,
    return
  }
  func.func @transform_0(%arg0: i32) -> (i32, i32, i32, i32) {
    %c0_i32 = arith.constant 0 : i32
    %c0_i32_0 = arith.constant 0 : i32
    %c0_i32_1 = arith.constant 0 : i32
    %c0_i32_2 = arith.constant 0 : i32
    return %arg0, %c0_i32, %c0_i32_0, %c0_i32_1 : i32, i32, i32, i32
  }
  func.func @transform_1(%arg0: i32) -> i32 {
    %c0_i32 = arith.constant 0 : i32
    %c0_i32_0 = arith.constant 0 : i32
    return %c0_i32 : i32
  }
  func.func @transform_2(%arg0: i32) -> i32 {
    %c0_i32 = arith.constant 0 : i32
    %c0_i32_0 = arith.constant 0 : i32
    return %c0_i32 : i32
  }
  func.func @transform_3(%arg0: i32) -> i32 {
    %c0_i32 = arith.constant 0 : i32
    %c0_i32_0 = arith.constant 0 : i32
    return %c0_i32 : i32
  }
  func.func @transform_4(%arg0: i32) -> i32 {
    %c0_i32 = arith.constant 0 : i32
    %c0_i32_0 = arith.constant 0 : i32
    return %c0_i32 : i32
  }
  func.func @transform_5(%arg0: i32) -> i32 {
    %c0_i32 = arith.constant 0 : i32
    %c0_i32_0 = arith.constant 0 : i32
    return %c0_i32 : i32
  }
  func.func @transform_6(%arg0: i32) -> (i32, i32, i32) {
    %c0_i32 = arith.constant 0 : i32
    %c0_i32_0 = arith.constant 0 : i32
    %c0_i32_1 = arith.constant 0 : i32
    return %arg0, %c0_i32, %c0_i32_0 : i32, i32, i32
  }
}

</mosaic_0001>

<bundles_post_ra>
// kernel: tpu_custom_call.1
= control target key start
LH: loop header
LB: loop body
LE: loop exit
PB: predicated region body
PF: predicated region fallthrough
CT: control target
= control target key end

     0   :  { %11 = vsyncpa [#allocation4], 0  ;;  %s2001_s0 = inlined_call_operand.vmem [shape: f32[1,4,32,2], index: 0, kind: input, shape index: {}]   ;;  %s2002_s1 = inlined_call_operand.vmem [shape: f32[32], index: 1, kind: input, shape index: {}]   ;;  %s2003_s2 = inlined_call_operand.vmem [shape: f32[16], index: 2, kind: input, shape index: {}]   ;;  %s2004_s3 = inlined_call_operand.vmem [shape: f32[16], index: 3, kind: input, shape index: {}]   ;;  %s2005_s4 = inlined_call_operand.vmem [shape: f32[6], index: 4, kind: input, shape index: {}]   ;;  %s2006_s5 = inlined_call_operand.vmem [shape: f32[6], index: 5, kind: input, shape index: {}]   ;;  %s2007_s6 = inlined_call_operand.hbm [shape: f32[1,1,2], index: 6, kind: output, shape index: {}]  }
   0x1   :  { %12 = vsyncpa [#allocation6], 0 }
   0x2   :  { %13 = vsyncpa [#allocation9], 0  ;;  %s33_s23 = sshll.u32 %s2003_s2, 4  ;;  %s34_s23 = int_to_ptr.vmem [resolvable:$true] %s33_s23 }
   0x3   :  { %14 = vsyncpa [#allocation3], 0  ;;  %s53_s26 = sshll.u32 %s2005_s4, 4  ;;  %s1030_s27 = scalar_lea.vmem %s34_s23, 16  ;;  %s54_s26 = int_to_ptr.vmem [resolvable:$true] %s53_s26 }
   0x4   :  { %p1031_p0 = scmp.ne.s32.totalorder %s34_s23, %s1030_s27  ;;  %p1035_p1 = scmp.lt.s32.totalorder %s34_s23, %s34_s23 }
   0x5   :  { %p1036_p2 = scmp.lt.s32.totalorder %s1030_s27, %s1030_s27 }
   0x7   :  { %p1037_p3 = por %p1036_p2, %p1035_p1 }
   0x9   :  { %p1038_p4 = pnand %p1037_p3, %p1031_p0 }
   0xb   :  { %1041 = shalt.err (!%p1038_p4)
}
   0xc   :  { %s1120_s28 = smov [#allocation5]   ;;  %s1042_s29 = scalar_lea.vmem %s54_s26, 16 }
   0xd   :  { %36 = dma.vmem_to_smem %s34_s23, 16, %s1120_s28, [#allocation6]  }
   0xe   :  { %p1043_p5 = scmp.ne.s32.totalorder %s54_s26, %s1042_s29  ;;  %p1047_p6 = scmp.lt.s32.totalorder %s54_s26, %s54_s26 }
   0xf   :  { %p1048_p7 = scmp.lt.s32.totalorder %s1042_s29, %s1042_s29 }
  0x11   :  { %p1049_p8 = por %p1048_p7, %p1047_p6 }
  0x13   :  { %p1050_p9 = pnand %p1049_p8, %p1043_p5 }
  0x15   :  { %1053 = shalt.err (!%p1050_p9)
}
  0x16   :  { %s1121_s2 = smov [#allocation8]   ;;  %s23_s7 = sshll.u32 %s2002_s1, 4  ;;  %s24_s7 = int_to_ptr.vmem [resolvable:$true] %s23_s7 }
  0x17   :  { %56 = dma.vmem_to_smem %s54_s26, 16, %s1121_s2, [#allocation9]  }
  0x18   :  { %s43_s10 = sshll.u32 %s2004_s3, 4  ;;  %s1054_s11 = scalar_lea.vmem %s24_s7, 16  ;;  %s44_s10 = int_to_ptr.vmem [resolvable:$true] %s43_s10 }
  0x19   :  { %p1055_p10 = scmp.ne.s32.totalorder %s24_s7, %s1054_s11  ;;  %p1059_p11 = scmp.lt.s32.totalorder %s24_s7, %s24_s7 }
  0x1a   :  { %p1060_p12 = scmp.lt.s32.totalorder %s1054_s11, %s1054_s11 }
  0x1c   :  { %p1061_p13 = por %p1060_p12, %p1059_p11 }
  0x1e   :  { %p1062_p0 = pnand %p1061_p13, %p1055_p10 }
  0x20   :  { %1065 = shalt.err (!%p1062_p0)
}
  0x21   :  { %s1122_s12 = smov [#allocation2]   ;;  %s1066_s13 = scalar_lea.vmem %s44_s10, 16 }
  0x22   :  { %26 = dma.vmem_to_smem %s24_s7, 16, %s1122_s12, [#allocation4]  }
  0x23   :  { %p1067_p1 = scmp.ne.s32.totalorder %s44_s10, %s1066_s13  ;;  %p1071_p2 = scmp.lt.s32.totalorder %s44_s10, %s44_s10 }
  0x24   :  { %p1072_p3 = scmp.lt.s32.totalorder %s1066_s13, %s1066_s13 }
  0x26   :  { %p1073_p4 = por %p1072_p3, %p1071_p2 }
  0x28   :  { %p1074_p5 = pnand %p1073_p4, %p1067_p1 }
  0x2a   :  { %1077 = shalt.err (!%p1074_p5)
}
  0x2b   :  { %s1123_s1 = smov [#allocation7]   ;;  %s63_s15 = sshll.u32 %s2006_s5, 4  ;;  %s64_s15 = int_to_ptr.vmem [resolvable:$true] %s63_s15 }
  0x2c   :  { %46 = dma.vmem_to_smem %s44_s10, 16, %s1123_s1, [#allocation6]  }
  0x2d   :  { %s1078_s16 = scalar_lea.vmem %s64_s15, 16  ;;  %p1083_p7 = scmp.lt.s32.totalorder %s64_s15, %s64_s15 }
  0x2e   :  { %p1079_p6 = scmp.ne.s32.totalorder %s64_s15, %s1078_s16  ;;  %p1084_p8 = scmp.lt.s32.totalorder %s1078_s16, %s1078_s16 }
  0x30   :  { %p1085_p9 = por %p1084_p8, %p1083_p7 }
  0x32   :  { %p1086_p10 = pnand %p1085_p9, %p1079_p6 }
  0x34   :  { %1089 = shalt.err (!%p1086_p10)
}
  0x35   :  { %s1124_s17 = smov [#allocation10]  }
  0x36   :  { %66 = dma.vmem_to_smem %s64_s15, 16, %s1124_s17, [#allocation9]  }
  0x37   :  { %1112 = dma.done.wait [#allocation4], 16  }
  0x38   :  { %1113 = vsyncadd [#allocation4], 4294967280 }
  0x39   :  { %1114 = dma.done.wait [#allocation6], 32  }
  0x3a   :  { %1115 = vsyncadd [#allocation6], 4294967264 }
  0x3b   :  { %1116 = dma.done.wait [#allocation9], 32  }
  0x3c   :  { %1117 = vsyncadd [#allocation9], 4294967264 }
  0x3d   :  { %82 = sfence }
  0x3e   :  { %s83_s18 = sld [smem:[#allocation2]]  ;;  %s937_s19 = sld [smem:[#allocation2 + $0x1]]  ;;  %v1179_v0 = vld [vmem:[%s2001_s0] sm:$0xff]  ;;  %v1184_v1 = vld [vmem:[%s2001_s0 + $0x8] sm:$0xff]  ;;  %v1189_v2 = vld [vmem:[%s2001_s0 + $0x10] sm:$0xff]  ;;  %vm336_vm0 = vcmask 15360  }
  0x3f   :  { %s940_s5 = sld [smem:[#allocation2 + $0x4]]  ;;  %s941_s20 = sld [smem:[#allocation2 + $0x5]]  ;;  %v1194_v3 = vld [vmem:[%s2001_s0 + $0x18] sm:$0xff]  ;;  %v1199_v4 = vld [vmem:[%s2001_s0 + $0x20] sm:$0xff]  ;;  %v1204_v5 = vld [vmem:[%s2001_s0 + $0x28] sm:$0xff]  ;;  %vm918_vm1 = vcmask 8192  }
  0x40   :  { %s944_s21 = sld [smem:[#allocation2 + $0x8]]  ;;  %s1206_s8 = sld [smem:[#allocation2 + $0x9]]  ;;  %v1213_v6 = vld [vmem:[%s2001_s0 + $0x30] sm:$0xff]  ;;  %v1218_v7 = vld [vmem:[%s2001_s0 + $0x38] sm:$0xff]  ;;  %v1227_v14 = vld [vmem:[%s2001_s0 + $0x40] sm:$0xff] }
  0x41   :  { %s1208_s9 = sld [smem:[#allocation2 + $0xc]]  ;;  %v1232_v15 = vld [vmem:[%s2001_s0 + $0x48] sm:$0xff]  ;;  %v1237_v16 = vld [vmem:[%s2001_s0 + $0x50] sm:$0xff]  ;;  %v1246_v21 = vld [vmem:[%s2001_s0 + $0x58] sm:$0xff]  ;;  %s1248_s22 = sld [smem:[#allocation2 + $0x2]] }
  0x42   :  { %s1253_s23 = sld [smem:[#allocation2 + $0xd]]  ;;  %v1258_v31 = vld [vmem:[%s2001_s0 + $0x60] sm:$0xff]  ;;  %v1263_v32 = vld [vmem:[%s2001_s0 + $0x68] sm:$0xff]  ;;  %v1268_v33 = vld [vmem:[%s2001_s0 + $0x70] sm:$0xff]  ;;  %s1273_s27 = sld [smem:[#allocation2 + $0x6]] }
  0x43   :  { %v1278_v38 = vld [vmem:[%s2001_s0 + $0x78] sm:$0xff]  ;;  %s1286_s2 = sld [smem:[#allocation2 + $0xa]]  ;;  %s1301_s4 = sld [smem:[#allocation2 + $0xe]] }
  0x44   :  { %v175_v8 = vstv %s83_s18  ;;  %v211_v23 = vstv %s937_s19  ;;  %s1306_s30 = sld [smem:[#allocation2 + $0x3]]  ;;  %s1310_s7 = sld [smem:[#allocation2 + $0x7]] }
  0x45   :  { %v176_v9 = vmul.f32 %v175_v8, %v1179_v0  ;;  %v177_v10 = vmul.f32 %v175_v8, %v1184_v1  ;;  %v178_v11 = vmul.f32 %v175_v8, %v1189_v2  ;;  %v179_v12 = vmul.f32 %v175_v8, %v1194_v3  ;;  %s1356_s10 = sld [smem:[#allocation2 + $0x10]]  ;;  %s1358_s11 = sld [smem:[#allocation2 + $0x14]] }
  0x46   :  { %v180_v13 = vstv %s940_s5  ;;  %v189_v22 = vstv %s944_s21  ;;  %v216_v26 = vstv %s941_s20  ;;  %v212_v37 = vmul.f32 %v211_v23, %v1179_v0  ;;  %s1372_s12 = sld [smem:[#allocation8]]  ;;  %s1380_s1 = sld [smem:[#allocation2 + $0x11]] }
  0x47   :  { %v181_v17 = vmul.f32 %v180_v13, %v1199_v4  ;;  %v182_v18 = vmul.f32 %v180_v13, %v1204_v5  ;;  %v183_v19 = vmul.f32 %v180_v13, %v1213_v6  ;;  %v184_v20 = vmul.f32 %v180_v13, %v1218_v7  ;;  %s1377_s13 = sld [smem:[#allocation2 + $0x18]]  ;;  %s1385_s3 = sld [smem:[#allocation2 + $0x15]] }
  0x48   :  { %v190_v28 = vmul.f32 %v189_v22, %v1227_v14  ;;  %v191_v29 = vmul.f32 %v189_v22, %v1232_v15  ;;  %v192_v30 = vmul.f32 %v189_v22, %v1237_v16  ;;  %v193_v35 = vmul.f32 %v189_v22, %v1246_v21  ;;  %s1387_s14 = sld [smem:[#allocation2 + $0x1c]]  ;;  %s1401_s15 = sld [smem:[#allocation2 + $0x19]] }
  0x49   :  { %v185_v24 = vadd.f32 %v181_v17, %v176_v9  ;;  %v186_v25 = vadd.f32 %v182_v18, %v177_v10  ;;  %v187_v27 = vadd.f32 %v183_v19, %v178_v11  ;;  %v188_v34 = vadd.f32 %v184_v20, %v179_v12  ;;  %s1403_s16 = sld [smem:[#allocation2 + $0x1d]]  ;;  %s1426_s17 = sld [smem:[#allocation2 + $0x12]] }
  0x4a   :  { %v198_v36 = vstv %s1208_s9  ;;  %v213_v39 = vmul.f32 %v211_v23, %v1184_v1  ;;  %v214_v40 = vmul.f32 %v211_v23, %v1189_v2  ;;  %v217_v41 = vmul.f32 %v216_v26, %v1199_v4  ;;  %s1335_s9 = sld [smem:[#allocation2 + $0xf]]  ;;  %s1432_s18 = sld [smem:[#allocation2 + $0x16]] }
  0x4b   :  { %v225_v42 = vstv %s1206_s8  ;;  %v194_v43 = vadd.f32 %v190_v28, %v185_v24  ;;  %v195_v44 = vadd.f32 %v191_v29, %v186_v25  ;;  %v218_v45 = vmul.f32 %v216_v26, %v1204_v5  ;;  %s1333_s8 = sld [smem:[#allocation2 + $0xb]]  ;;  %s1446_s5 = sld [smem:[#allocation2 + $0x1a]] }
  0x4c   :  { %v219_v46 = vmul.f32 %v216_v26, %v1213_v6  ;;  %v196_v47 = vadd.f32 %v192_v30, %v187_v27  ;;  %v199_v48 = vmul.f32 %v198_v36, %v1258_v31  ;;  %v200_v49 = vmul.f32 %v198_v36, %v1263_v32  ;;  %s1473_s24 = sld [smem:[#allocation2 + $0x17]]  ;;  %s1478_s25 = sld [smem:[#allocation2 + $0x1b]] }
  0x4d   :  { %v201_v50 = vmul.f32 %v198_v36, %v1268_v33  ;;  %v197_v51 = vadd.f32 %v193_v35, %v188_v34  ;;  %v202_v52 = vmul.f32 %v198_v36, %v1278_v38  ;;  %v215_v53 = vmul.f32 %v211_v23, %v1194_v3  ;;  %s1482_s19 = sld [smem:[#allocation2 + $0x1f]]  ;;  %s1502_s21 = sld [smem:[#allocation5]] }
  0x4e   :  { %v220_v54 = vmul.f32 %v216_v26, %v1218_v7  ;;  %v221_v55 = vadd.f32 %v217_v41, %v212_v37  ;;  %v226_v56 = vmul.f32 %v225_v42, %v1227_v14  ;;  %v222_v57 = vadd.f32 %v218_v45, %v213_v39  ;;  %s1506_s20 = sld [smem:[#allocation5 + $0x1]]  ;;  %s1535_s28 = sld [smem:[#allocation5 + $0x3]] }
  0x4f   :  { %v223_v58 = vadd.f32 %v219_v46, %v214_v40  ;;  %v227_v59 = vmul.f32 %v225_v42, %v1232_v15  ;;  %v228_v60 = vmul.f32 %v225_v42, %v1237_v16  ;;  %v203_v61 = vadd.f32 %v199_v48, %v194_v43  ;;  %s1514_s26 = sld [smem:[#allocation8 + $0x1]]  ;;  %s1537_s29 = sld [smem:[#allocation5 + $0x4]] }
  0x50   :  { %v204_v62 = vadd.f32 %v200_v49, %v195_v44  ;;  %v205_v63 = vadd.f32 %v201_v50, %v196_v47  ;;  %v1297_v8 = vadd.f32 %v202_v52, %v197_v51  ;;  %v224_v9 = vadd.f32 %v220_v54, %v215_v53 }
  0x51   :  { %v234_v10 = vstv %s1253_s23  ;;  %v251_v11 = vstv %s1248_s22  ;;  %v229_v12 = vmul.f32 %v225_v42, %v1246_v21  ;;  %v230_v13 = vadd.f32 %v226_v56, %v221_v55  ;;  %s1454_s22 = sld [smem:[#allocation2 + $0x1e]]  ;;  %s1458_s23 = sld [smem:[#allocation2 + $0x13]] }
  0x52   :  { %v235_v17 = vmul.f32 %v234_v10, %v1258_v31  ;;  %v256_v18 = vstv %s1273_s27  ;;  %v231_v19 = vadd.f32 %v227_v59, %v222_v57  ;;  %v232_v20 = vadd.f32 %v228_v60, %v223_v58  ;;  %s1524_s27 = sld [smem:[#allocation5 + $0x2]] }
  0x53   :  { %v252_v22 = vmul.f32 %v251_v11, %v1179_v0  ;;  %v253_v23 = vmul.f32 %v251_v11, %v1184_v1  ;;  %v236_v24 = vmul.f32 %v234_v10, %v1263_v32  ;;  %v237_v25 = vmul.f32 %v234_v10, %v1268_v33 }
  0x54   :  { %v254_v26 = vmul.f32 %v251_v11, %v1189_v2  ;;  %v265_v27 = vstv %s1286_s2  ;;  %v255_v28 = vmul.f32 %v251_v11, %v1194_v3  ;;  %v257_v29 = vmul.f32 %v256_v18, %v1199_v4  ;;  %s1541_s2 = sld [smem:[#allocation5 + $0x5]] }
  0x55   :  { %v258_v30 = vmul.f32 %v256_v18, %v1204_v5  ;;  %v259_v34 = vmul.f32 %v256_v18, %v1213_v6  ;;  %v233_v35 = vadd.f32 %v229_v12, %v224_v9  ;;  %v238_v36 = vmul.f32 %v234_v10, %v1278_v38 }
  0x56   :  { %v239_v37 = vadd.f32 %v235_v17, %v230_v13  ;;  %v260_v39 = vmul.f32 %v256_v18, %v1218_v7  ;;  %v207_v40 = vmul.f32 %v203_v61, %v1179_v0  ;;  %v208_v41 = vmul.f32 %v204_v62, %v1184_v1 }
  0x57   :  { %v261_v42 = vadd.f32 %v257_v29, %v252_v22  ;;  %v262_v43 = vadd.f32 %v258_v30, %v253_v23  ;;  %v1325_v44 = vmul.f32 %v205_v63, %v1189_v2  ;;  %v240_v45 = vadd.f32 %v236_v24, %v231_v19 }
  0x58   :  { %v241_v46 = vadd.f32 %v237_v25, %v232_v20  ;;  %v263_v47 = vadd.f32 %v259_v34, %v254_v26  ;;  %v264_v48 = vadd.f32 %v260_v39, %v255_v28  ;;  %v266_v49 = vmul.f32 %v265_v27, %v1227_v14 }
  0x59   :  { %v267_v50 = vmul.f32 %v265_v27, %v1232_v15  ;;  %v268_v51 = vmul.f32 %v265_v27, %v1237_v16  ;;  %v242_v52 = vadd.f32 %v238_v36, %v233_v35  ;;  %v243_v53 = vmul.f32 %v239_v37, %v1199_v4 }
  0x5a   :  { %v269_v54 = vmul.f32 %v265_v27, %v1246_v21  ;;  %v274_v55 = vstv %s1301_s4  ;;  %v270_v56 = vadd.f32 %v266_v49, %v261_v42  ;;  %v291_v59 = vstv %s1306_s30  ;;  %s1558_s4 = sld [smem:[#allocation5 + $0x6]]  ;;  %s1560_s30 = sld [smem:[#allocation5 + $0x7]] }
  0x5b   :  { %v271_v57 = vadd.f32 %v267_v50, %v262_v43  ;;  %v275_v58 = vmul.f32 %v274_v55, %v1258_v31  ;;  %v244_v60 = vmul.f32 %v240_v45, %v1204_v5  ;;  %v272_v61 = vadd.f32 %v268_v51, %v263_v47 }
  0x5c   :  { %v276_v62 = vmul.f32 %v274_v55, %v1263_v32  ;;  %v296_v63 = vstv %s1310_s7  ;;  %v273_v9 = vadd.f32 %v269_v54, %v264_v48  ;;  %v277_v10 = vmul.f32 %v274_v55, %v1268_v33  ;;  %s1588_s7 = sld [smem:[#allocation5 + $0x8]] }
  0x5d   :  { %v278_v11 = vmul.f32 %v274_v55, %v1278_v38  ;;  %v279_v12 = vadd.f32 %v275_v58, %v270_v56  ;;  %v292_v13 = vmul.f32 %v291_v59, %v1179_v0  ;;  %v293_v17 = vmul.f32 %v291_v59, %v1184_v1 }
  0x5e   :  { %v294_v18 = vmul.f32 %v291_v59, %v1189_v2  ;;  %v295_v19 = vmul.f32 %v291_v59, %v1194_v3  ;;  %v280_v20 = vadd.f32 %v276_v62, %v271_v57  ;;  %v297_v22 = vmul.f32 %v296_v63, %v1199_v4 }
  0x5f   :  { %v298_v23 = vmul.f32 %v296_v63, %v1204_v5  ;;  %v299_v24 = vmul.f32 %v296_v63, %v1213_v6  ;;  %v210_v25 = vmul.f32 %v1297_v8, %v1194_v3  ;;  %v245_v26 = vmul.f32 %v241_v46, %v1213_v6 }
  0x60   :  { %v246_v27 = vmul.f32 %v242_v52, %v1218_v7  ;;  %v300_v28 = vmul.f32 %v296_v63, %v1218_v7  ;;  %v247_v29 = vadd.f32 %v243_v53, %v207_v40  ;;  %v248_v30 = vadd.f32 %v244_v60, %v208_v41 }
  0x61   :  { %v281_v34 = vadd.f32 %v277_v10, %v272_v61  ;;  %v282_v35 = vadd.f32 %v278_v11, %v273_v9  ;;  %v301_v36 = vadd.f32 %v297_v22, %v292_v13  ;;  %v302_v37 = vadd.f32 %v298_v23, %v293_v17 }
  0x62   :  { %v303_v39 = vadd.f32 %v299_v24, %v294_v18  ;;  %v304_v8 = vadd.f32 %v300_v28, %v295_v19  ;;  %v283_v42 = vmul.f32 %v279_v12, %v1227_v14  ;;  %v284_v43 = vmul.f32 %v280_v20, %v1232_v15 }
  0x63   :  { %v305_v45 = vstv %s1333_s8  ;;  %v314_v46 = vstv %s1335_s9  ;;  %v249_v57 = vadd.f32 %v245_v26, %v1325_v44  ;;  %v250_v58 = vadd.f32 %v246_v27, %v210_v25  ;;  %s1597_s8 = sld [smem:[#allocation5 + $0x9]]  ;;  %s1604_s9 = sld [smem:[#allocation8 + $0x2]] }
  0x64   :  { %v306_v47 = vmul.f32 %v305_v45, %v1227_v14  ;;  %v307_v48 = vmul.f32 %v305_v45, %v1232_v15  ;;  %v308_v40 = vmul.f32 %v305_v45, %v1237_v16  ;;  %v309_v41 = vmul.f32 %v305_v45, %v1246_v21 }
  0x65   :  { %v315_v49 = vmul.f32 %v314_v46, %v1258_v31  ;;  %v316_v50 = vmul.f32 %v314_v46, %v1263_v32  ;;  %v317_v51 = vmul.f32 %v314_v46, %v1268_v33  ;;  %v318_v52 = vmul.f32 %v314_v46, %v1278_v38 }
  0x66   :  { %v310_v53 = vadd.f32 %v306_v47, %v301_v36  ;;  %v311_v54 = vadd.f32 %v307_v48, %v302_v37  ;;  %v312_v55 = vadd.f32 %v308_v40, %v303_v39  ;;  %v313_v56 = vadd.f32 %v309_v41, %v304_v8 }
  0x67   :  { %v285_v59 = vmul.f32 %v281_v34, %v1237_v16  ;;  %v286_v60 = vmul.f32 %v282_v35, %v1246_v21  ;;  %v287_v10 = vadd.f32 %v283_v42, %v247_v29  ;;  %v353_v11 = vstv %s1356_s10  ;;  %s1611_s10 = sld [smem:[#allocation5 + $0xa]] }
  0x68   :  { %v319_v61 = vadd.f32 %v315_v49, %v310_v53  ;;  %v320_v62 = vadd.f32 %v316_v50, %v311_v54  ;;  %v321_v63 = vadd.f32 %v317_v51, %v312_v55  ;;  %v322_v9 = vadd.f32 %v318_v52, %v313_v56 }
  0x69   :  { %v288_v12 = vadd.f32 %v284_v43, %v248_v30  ;;  %v358_v17 = vstv %s1358_s11  ;;  %v289_v18 = vadd.f32 %v285_v59, %v249_v57  ;;  %v290_v19 = vadd.f32 %v286_v60, %v250_v58  ;;  %s1613_s11 = sld [smem:[#allocation5 + $0xb]] }
  0x6a   :  { %v323_v13 = vmul.f32 %v319_v61, %v1258_v31  ;;  %v324_v44 = vmul.f32 %v320_v62, %v1263_v32  ;;  %v325_v20 = vmul.f32 %v321_v63, %v1268_v33  ;;  %v326_v22 = vmul.f32 %v322_v9, %v1278_v38 }
  0x6b   :  { %v354_v23 = vmul.f32 %v353_v11, %v1179_v0  ;;  %v355_v24 = vmul.f32 %v353_v11, %v1184_v1  ;;  %v356_v25 = vmul.f32 %v353_v11, %v1189_v2  ;;  %v359_v26 = vmul.f32 %v358_v17, %v1199_v4 }
  0x6c   :  { %v360_v27 = vmul.f32 %v358_v17, %v1204_v5  ;;  %v361_v28 = vmul.f32 %v358_v17, %v1213_v6  ;;  %v327_v29 = vadd.f32 %v323_v13, %v287_v10  ;;  %v328_v30 = vadd.f32 %v324_v44, %v288_v12 }
  0x6d   :  { %v357_v34 = vmul.f32 %v353_v11, %v1194_v3  ;;  %v362_v35 = vmul.f32 %v358_v17, %v1218_v7  ;;  %v331_v36 = vstv %s1372_s12  ;;  %v329_v37 = vadd.f32 %v325_v20, %v289_v18  ;;  %s1625_s12 = sld [smem:[#allocation5 + $0xc]] }
  0x6e   :  { %v330_v39 = vadd.f32 %v326_v22, %v290_v19  ;;  %v367_v8 = vstv %s1377_s13  ;;  %v363_v42 = vadd.f32 %v359_v26, %v354_v23  ;;  %v364_v43 = vadd.f32 %v360_v27, %v355_v24  ;;  %s1635_s13 = sld [smem:[#allocation5 + $0xd]] }
  0x6f   :  { %v365_v45 = vadd.f32 %v361_v28, %v356_v25  ;;  %v1405_v46 = vadd.f32 %v331_v36, %v327_v29  ;;  %v1407_v47 = vadd.f32 %v331_v36, %v328_v30  ;;  %v366_v48 = vadd.f32 %v362_v35, %v357_v34 }
  0x70   :  { %v389_v40 = vstv %s1380_s1  ;;  %v368_v41 = vmul.f32 %v367_v8, %v1227_v14  ;;  %v369_v49 = vmul.f32 %v367_v8, %v1232_v15  ;;  %v370_v50 = vmul.f32 %v367_v8, %v1237_v16  ;;  %s1650_s1 = sld [smem:[#allocation5 + $0xe]] }
  0x71   :  { %v394_v51 = vstv %s1385_s3  ;;  %v1414_v52 = vadd.f32 %v331_v36, %v329_v37  ;;  %v1416_v53 = vadd.f32 %v331_v36, %v330_v39  ;;  %v376_v54 = vstv %s1387_s14  ;;  %s1652_s3 = sld [smem:[#allocation5 + $0xf]]  ;;  %s1784_s14 = sld [smem:[#allocation7 + $0x4]] }
  0x72   :  { %v390_v55 = vmul.f32 %v389_v40, %v1179_v0  ;;  %v337_v56 = vsel %vm336_vm0, %v1405_v46, 0.0  ;;  %v338_v57 = vsel %vm336_vm0, %v1407_v47, 0.0  ;;  %v371_v58 = vmul.f32 %v367_v8, %v1246_v21 }
  0x73   :  { %v391_v59 = vmul.f32 %v389_v40, %v1184_v1  ;;  %v392_v60 = vmul.f32 %v389_v40, %v1189_v2  ;;  %v393_v61 = vmul.f32 %v389_v40, %v1194_v3  ;;  %v395_v62 = vmul.f32 %v394_v51, %v1199_v4 }
  0x74   :  { %v396_v63 = vmul.f32 %v394_v51, %v1204_v5  ;;  %v372_v9 = vadd.f32 %v368_v41, %v363_v42  ;;  %v373_v10 = vadd.f32 %v369_v49, %v364_v43  ;;  %v374_v11 = vadd.f32 %v370_v50, %v365_v45 }
  0x75   :  { %v377_v12 = vmul.f32 %v376_v54, %v1258_v31  ;;  %v378_v13 = vmul.f32 %v376_v54, %v1263_v32  ;;  %v397_v44 = vmul.f32 %v394_v51, %v1213_v6  ;;  %v398_v17 = vmul.f32 %v394_v51, %v1218_v7 }
  0x76   :  { %v399_v18 = vadd.f32 %v395_v62, %v390_v55  ;;  %v379_v19 = vmul.f32 %v376_v54, %v1268_v33  ;;  %v400_v20 = vadd.f32 %v396_v63, %v391_v59  ;;  %v403_v22 = vstv %s1401_s15  ;;  %s1791_s15 = sld [smem:[#allocation7 + $0x5]] }
  0x77   :  { %v412_v23 = vstv %s1403_s16  ;;  %v401_v24 = vadd.f32 %v397_v44, %v392_v60  ;;  %v402_v25 = vadd.f32 %v398_v17, %v393_v61  ;;  %v404_v26 = vmul.f32 %v403_v22, %v1227_v14  ;;  %s1809_s16 = sld [smem:[#allocation7 + $0x6]] }
  0x78   :  { %v405_v27 = vmul.f32 %v403_v22, %v1232_v15  ;;  %v375_v28 = vadd.f32 %v371_v58, %v366_v48  ;;  %v406_v29 = vmul.f32 %v403_v22, %v1237_v16  ;;  %v407_v30 = vmul.f32 %v403_v22, %v1246_v21 }
  0x79   :  { %v413_v34 = vmul.f32 %v412_v23, %v1258_v31  ;;  %v380_v35 = vmul.f32 %v376_v54, %v1278_v38  ;;  %v408_v36 = vadd.f32 %v404_v26, %v399_v18  ;;  %v414_v39 = vmul.f32 %v412_v23, %v1263_v32 }
  0x7a   :  { %v409_v37 = vadd.f32 %v405_v27, %v400_v20  ;;  %v1452_v8 = vsel %vm336_vm0, %v1414_v52, 0.0  ;;  %v381_v42 = vadd.f32 %v377_v12, %v372_v9  ;;  %v382_v43 = vadd.f32 %v378_v13, %v373_v10 }
  0x7b   :  { %v383_v45 = vadd.f32 %v379_v19, %v374_v11  ;;  %v410_v48 = vadd.f32 %v406_v29, %v401_v24  ;;  %v411_v40 = vadd.f32 %v407_v30, %v402_v25  ;;  %v415_v41 = vmul.f32 %v412_v23, %v1268_v33 }
  0x7c   :  { %v429_v49 = vstv %s1426_s17  ;;  %v416_v50 = vmul.f32 %v412_v23, %v1278_v38  ;;  %v417_v51 = vadd.f32 %v413_v34, %v408_v36  ;;  %v418_v54 = vadd.f32 %v414_v39, %v409_v37  ;;  %s1811_s17 = sld [smem:[#allocation7 + $0x7]] }
  0x7d   :  { %v434_v55 = vstv %s1432_s18  ;;  %v1462_v58 = vadd.f32 %v338_v57, %v337_v56  ;;  %v384_v59 = vadd.f32 %v380_v35, %v375_v28  ;;  %v430_v60 = vmul.f32 %v429_v49, %v1179_v0 }
  0x7e   :  { %v431_v61 = vmul.f32 %v429_v49, %v1184_v1  ;;  %v385_v62 = vmul.f32 %v381_v42, %v1179_v0  ;;  %v386_v63 = vmul.f32 %v382_v43, %v1184_v1  ;;  %v387_v9 = vmul.f32 %v383_v45, %v1189_v2 }
  0x7f   :  { %v432_v10 = vmul.f32 %v429_v49, %v1189_v2  ;;  %v419_v11 = vadd.f32 %v415_v41, %v410_v48  ;;  %v433_v12 = vmul.f32 %v429_v49, %v1194_v3  ;;  %v435_v56 = vmul.f32 %v434_v55, %v1199_v4 }
  0x80   :  { %v436_v57 = vmul.f32 %v434_v55, %v1204_v5  ;;  %v420_v13 = vadd.f32 %v416_v50, %v411_v40  ;;  %v421_v44 = vmul.f32 %v417_v51, %v1199_v4  ;;  %v422_v17 = vmul.f32 %v418_v54, %v1204_v5 }
  0x81   :  { %v437_v18 = vmul.f32 %v434_v55, %v1213_v6  ;;  %v438_v19 = vmul.f32 %v434_v55, %v1218_v7  ;;  %v439_v20 = vadd.f32 %v435_v56, %v430_v60  ;;  %v443_v23 = vstv %s1446_s5 }
  0x82   :  { %v440_v22 = vadd.f32 %v436_v57, %v431_v61  ;;  %v444_v25 = vmul.f32 %v443_v23, %v1227_v14  ;;  %v445_v26 = vmul.f32 %v443_v23, %v1232_v15  ;;  %v446_v27 = vmul.f32 %v443_v23, %v1237_v16 }
  0x83   :  { %v441_v24 = vadd.f32 %v437_v18, %v432_v10  ;;  %v388_v28 = vmul.f32 %v384_v59, %v1194_v3  ;;  %v442_v29 = vadd.f32 %v438_v19, %v433_v12  ;;  %v447_v30 = vmul.f32 %v443_v23, %v1246_v21 }
  0x84   :  { %v452_v34 = vstv %s1454_s22  ;;  %v448_v35 = vadd.f32 %v444_v25, %v439_v20  ;;  %v449_v36 = vadd.f32 %v445_v26, %v440_v22  ;;  %v469_v39 = vstv %s1458_s23 }
  0x85   :  { %v453_v37 = vmul.f32 %v452_v34, %v1258_v31  ;;  %v423_v42 = vmul.f32 %v419_v11, %v1213_v6  ;;  %v450_v43 = vadd.f32 %v446_v27, %v441_v24  ;;  %v454_v45 = vmul.f32 %v452_v34, %v1263_v32 }
  0x86   :  { %v455_v48 = vmul.f32 %v452_v34, %v1268_v33  ;;  %v424_v40 = vmul.f32 %v420_v13, %v1218_v7  ;;  %v425_v41 = vadd.f32 %v421_v44, %v385_v62  ;;  %v426_v49 = vadd.f32 %v422_v17, %v386_v63 }
  0x87   :  { %v451_v50 = vadd.f32 %v447_v30, %v442_v29  ;;  %v456_v51 = vmul.f32 %v452_v34, %v1278_v38  ;;  %v457_v54 = vadd.f32 %v453_v37, %v448_v35  ;;  %v458_v55 = vadd.f32 %v454_v45, %v449_v36 }
  0x88   :  { %v470_v59 = vmul.f32 %v469_v39, %v1179_v0  ;;  %v471_v60 = vmul.f32 %v469_v39, %v1184_v1  ;;  %v472_v61 = vmul.f32 %v469_v39, %v1189_v2  ;;  %v473_v10 = vmul.f32 %v469_v39, %v1194_v3 }
  0x89   :  { %v474_v11 = vstv %s1473_s24  ;;  %v427_v12 = vadd.f32 %v423_v42, %v387_v9  ;;  %v459_v62 = vadd.f32 %v455_v48, %v450_v43  ;;  %v483_v56 = vstv %s1478_s25  ;;  %s1700_s24 = sld [smem:[#allocation7]] }
  0x8a   :  { %v475_v63 = vmul.f32 %v474_v11, %v1199_v4  ;;  %v476_v57 = vmul.f32 %v474_v11, %v1204_v5  ;;  %v477_v13 = vmul.f32 %v474_v11, %v1213_v6  ;;  %v478_v44 = vmul.f32 %v474_v11, %v1218_v7 }
  0x8b   :  { %v492_v17 = vstv %s1482_s19  ;;  %v460_v18 = vadd.f32 %v456_v51, %v451_v50  ;;  %v461_v19 = vmul.f32 %v457_v54, %v1227_v14  ;;  %v462_v20 = vmul.f32 %v458_v55, %v1232_v15 }
  0x8c   :  { %v479_v22 = vadd.f32 %v475_v63, %v470_v59  ;;  %v480_v9 = vadd.f32 %v476_v57, %v471_v60  ;;  %v481_v23 = vadd.f32 %v477_v13, %v472_v61  ;;  %v482_v24 = vadd.f32 %v478_v44, %v473_v10 }
  0x8d   :  { %v484_v25 = vmul.f32 %v483_v56, %v1227_v14  ;;  %v485_v26 = vmul.f32 %v483_v56, %v1232_v15  ;;  %v486_v27 = vmul.f32 %v483_v56, %v1237_v16  ;;  %v487_v29 = vmul.f32 %v483_v56, %v1246_v21 }
  0x8e   :  { %v493_v30 = vmul.f32 %v492_v17, %v1258_v31  ;;  %v494_v35 = vmul.f32 %v492_v17, %v1263_v32  ;;  %v495_v36 = vmul.f32 %v492_v17, %v1268_v33  ;;  %v496_v37 = vmul.f32 %v492_v17, %v1278_v38 }
  0x8f   :  { %v488_v34 = vadd.f32 %v484_v25, %v479_v22  ;;  %v463_v39 = vmul.f32 %v459_v62, %v1237_v16  ;;  %v489_v42 = vadd.f32 %v485_v26, %v480_v9  ;;  %v490_v43 = vadd.f32 %v486_v27, %v481_v23 }
  0x90   :  { %v491_v45 = vadd.f32 %v487_v29, %v482_v24  ;;  %v428_v48 = vadd.f32 %v424_v40, %v388_v28  ;;  %v464_v50 = vmul.f32 %v460_v18, %v1246_v21  ;;  %v465_v51 = vadd.f32 %v461_v19, %v425_v41 }
  0x91   :  { %v497_v54 = vadd.f32 %v493_v30, %v488_v34  ;;  %v498_v55 = vadd.f32 %v494_v35, %v489_v42  ;;  %v499_v59 = vadd.f32 %v495_v36, %v490_v43  ;;  %v530_v61 = vstv %s1502_s21 }
  0x92   :  { %v500_v60 = vadd.f32 %v496_v37, %v491_v45  ;;  %v341_v10 = vadd.f32 %v1452_v8, %v1462_v58  ;;  %v342_v11 = vsel %vm336_vm0, %v1416_v53, 0.0  ;;  %v535_v63 = vstv %s1506_s20  ;;  %s1863_s20 = sld [smem:[#allocation7 + $0x8]] }
  0x93   :  { %v501_v62 = vmul.f32 %v497_v54, %v1258_v31  ;;  %v466_v28 = vadd.f32 %v462_v20, %v426_v49  ;;  %v467_v40 = vadd.f32 %v463_v39, %v427_v12  ;;  %v502_v41 = vmul.f32 %v498_v55, %v1263_v32 }
  0x94   :  { %v503_v56 = vmul.f32 %v499_v59, %v1268_v33  ;;  %v468_v8 = vadd.f32 %v464_v50, %v428_v48  ;;  %v504_v58 = vmul.f32 %v500_v60, %v1278_v38  ;;  %v509_v57 = vstv %s1514_s26  ;;  %s1867_s26 = sld [smem:[#allocation8 + $0x4]] }
  0x95   :  { %v531_v13 = vmul.f32 %v530_v61, %v1179_v0  ;;  %v505_v44 = vadd.f32 %v501_v62, %v465_v51  ;;  %v532_v17 = vmul.f32 %v530_v61, %v1184_v1  ;;  %v536_v18 = vmul.f32 %v535_v63, %v1199_v4 }
  0x96   :  { %v537_v49 = vmul.f32 %v535_v63, %v1204_v5  ;;  %v533_v12 = vmul.f32 %v530_v61, %v1189_v2  ;;  %v534_v19 = vmul.f32 %v530_v61, %v1194_v3  ;;  %v538_v20 = vmul.f32 %v535_v63, %v1213_v6 }
  0x97   :  { %v539_v22 = vmul.f32 %v535_v63, %v1218_v7  ;;  %v506_v9 = vadd.f32 %v502_v41, %v466_v28  ;;  %v507_v23 = vadd.f32 %v503_v56, %v467_v40  ;;  %v544_v24 = vstv %s1524_s27  ;;  %s1886_s27 = sld [smem:[#allocation7 + $0xa]] }
  0x98   :  { %v508_v25 = vadd.f32 %v504_v58, %v468_v8  ;;  %v1554_v26 = vadd.f32 %v342_v11, %v341_v10  ;;  %v1556_v27 = vadd.f32 %v509_v57, %v505_v44  ;;  %v540_v29 = vadd.f32 %v536_v18, %v531_v13 }
  0x99   :  { %v541_v30 = vadd.f32 %v537_v49, %v532_v17  ;;  %v542_v34 = vadd.f32 %v538_v20, %v533_v12  ;;  %v543_v35 = vadd.f32 %v539_v22, %v534_v19  ;;  %v545_v36 = vmul.f32 %v544_v24, %v1227_v14 }
  0x9a   :  { %v546_v37 = vmul.f32 %v544_v24, %v1232_v15  ;;  %v1564_v39 = vadd.f32 %v509_v57, %v506_v9  ;;  %v1566_v42 = vadd.f32 %v509_v57, %v507_v23  ;;  %v553_v43 = vstv %s1535_s28  ;;  %s1720_s28 = sld [smem:[#allocation7 + $0x1]] }
  0x9b   :  { %v566_v45 = vstv %s1537_s29  ;;  %v1570_v48 = vadd.f32 %v509_v57, %v508_v25  ;;  %v547_v50 = vmul.f32 %v544_v24, %v1237_v16  ;;  %v548_v51 = vmul.f32 %v544_v24, %v1246_v21  ;;  %s1722_s29 = sld [smem:[#allocation8 + $0x3]] }
  0x9c   :  { %v571_v54 = vstv %s1541_s2  ;;  %v514_v55 = vsel %vm336_vm0, %v1556_v27, 0.0  ;;  %v515_v59 = vsel %vm336_vm0, %v1564_v39, 0.0  ;;  %v517_v60 = vsel %vm336_vm0, %v1566_v42, 0.0  ;;  %s1904_s2 = sld [smem:[#allocation7 + $0xd]] }
  0x9d   :  { %v567_v61 = vmul.f32 %v566_v45, %v1179_v0  ;;  %v549_v10 = vadd.f32 %v545_v36, %v540_v29  ;;  %v550_v11 = vadd.f32 %v546_v37, %v541_v30  ;;  %v554_v62 = vmul.f32 %v553_v43, %v1258_v31 }
  0x9e   :  { %v568_v63 = vmul.f32 %v566_v45, %v1184_v1  ;;  %v569_v28 = vmul.f32 %v566_v45, %v1189_v2  ;;  %v570_v40 = vmul.f32 %v566_v45, %v1194_v3  ;;  %v572_v41 = vmul.f32 %v571_v54, %v1199_v4 }
  0x9f   :  { %v573_v56 = vmul.f32 %v571_v54, %v1204_v5  ;;  %v551_v8 = vadd.f32 %v547_v50, %v542_v34  ;;  %v552_v58 = vadd.f32 %v548_v51, %v543_v35  ;;  %v555_v57 = vmul.f32 %v553_v43, %v1263_v32 }
  0xa0   :  { %v556_v13 = vmul.f32 %v553_v43, %v1268_v33  ;;  %v557_v44 = vmul.f32 %v553_v43, %v1278_v38  ;;  %v574_v17 = vmul.f32 %v571_v54, %v1213_v6  ;;  %v575_v18 = vmul.f32 %v571_v54, %v1218_v7 }
  0xa1   :  { %v576_v49 = vadd.f32 %v572_v41, %v567_v61  ;;  %v558_v12 = vadd.f32 %v554_v62, %v549_v10  ;;  %v577_v19 = vadd.f32 %v573_v56, %v568_v63  ;;  %v580_v20 = vstv %s1558_s4  ;;  %s1922_s4 = sld [smem:[#allocation7 + $0xe]] }
  0xa2   :  { %v589_v22 = vstv %s1560_s30  ;;  %v578_v9 = vadd.f32 %v574_v17, %v569_v28  ;;  %v579_v23 = vadd.f32 %v575_v18, %v570_v40  ;;  %v581_v24 = vmul.f32 %v580_v20, %v1227_v14  ;;  %s1924_s30 = sld [smem:[#allocation7 + $0xf]] }
  0xa3   :  { %v582_v25 = vmul.f32 %v580_v20, %v1232_v15  ;;  %v559_v29 = vadd.f32 %v555_v57, %v550_v11  ;;  %v583_v30 = vmul.f32 %v580_v20, %v1237_v16  ;;  %v584_v34 = vmul.f32 %v580_v20, %v1246_v21 }
  0xa4   :  { %v590_v35 = vmul.f32 %v589_v22, %v1258_v31  ;;  %v585_v36 = vadd.f32 %v581_v24, %v576_v49  ;;  %v591_v43 = vmul.f32 %v589_v22, %v1263_v32  ;;  %v592_v45 = vmul.f32 %v589_v22, %v1268_v33 }
  0xa5   :  { %v586_v37 = vadd.f32 %v582_v25, %v577_v19  ;;  %v516_v50 = vadd.f32 %v515_v59, %v514_v55  ;;  %v587_v51 = vadd.f32 %v583_v30, %v578_v9  ;;  %v588_v54 = vadd.f32 %v584_v34, %v579_v23 }
  0xa6   :  { %v593_v61 = vmul.f32 %v589_v22, %v1278_v38  ;;  %v560_v10 = vadd.f32 %v556_v13, %v551_v8  ;;  %v561_v11 = vadd.f32 %v557_v44, %v552_v58  ;;  %v594_v62 = vadd.f32 %v590_v35, %v585_v36 }
  0xa7   :  { %v595_v63 = vadd.f32 %v591_v43, %v586_v37  ;;  %v562_v28 = vmul.f32 %v558_v12, %v1405_v46  ;;  %v596_v40 = vadd.f32 %v592_v45, %v587_v51  ;;  %v627_v56 = vstv %s1588_s7  ;;  %s1946_s7 = sld [smem:[#allocation10]] }
  0xa8   :  { %v597_v41 = vadd.f32 %v593_v61, %v588_v54  ;;  %v563_v55 = vmul.f32 %v559_v29, %v1407_v47  ;;  %v598_v59 = vmul.f32 %v594_v62, %v1556_v27  ;;  %v344_v58 = vrot.slane %v1554_v26, 4 }
  0xa9   :  { %v599_v8 = vmul.f32 %v595_v63, %v1564_v39  ;;  %v518_v57 = vadd.f32 %v517_v60, %v516_v50  ;;  %v519_v13 = vsel %vm336_vm0, %v1570_v48, 0.0  ;;  %v564_v44 = vmul.f32 %v560_v10, %v1414_v52 }
  0xaa   :  { %v565_v17 = vmul.f32 %v561_v11, %v1416_v53  ;;  %v628_v18 = vmul.f32 %v627_v56, %v1179_v0  ;;  %v632_v49 = vstv %s1597_s8  ;;  %v600_v12 = vmul.f32 %v596_v40, %v1566_v42  ;;  %s1950_s8 = sld [smem:[#allocation8 + $0x5]] }
  0xab   :  { %v601_v19 = vmul.f32 %v597_v41, %v1570_v48  ;;  %v602_v20 = vadd.f32 %v598_v59, %v562_v28  ;;  %v633_v22 = vmul.f32 %v632_v49, %v1199_v4  ;;  %v603_v60 = vadd.f32 %v599_v8, %v563_v55  ;;  %v1683_v8 = vld [vmem:[%s2001_s0 + $0x8] sm:$0xff] }
  0xac   :  { %v606_v9 = vstv %s1604_s9  ;;  %v629_v23 = vmul.f32 %v627_v56, %v1184_v1  ;;  %v634_v24 = vmul.f32 %v632_v49, %v1204_v5  ;;  %v630_v0 = vmul.f32 %v627_v56, %v1189_v2  ;;  %s1952_s9 = sld [smem:[#allocation10 + $0x1]] }
  0xad   :  { %v635_v25 = vmul.f32 %v632_v49, %v1213_v6  ;;  %v1638_v29 = vadd.f32 %v344_v58, %v1554_v26  ;;  %v1640_v30 = vadd.f32 %v519_v13, %v518_v57  ;;  %v631_v4 = vmul.f32 %v627_v56, %v1194_v3  ;;  %v1689_v57 = vld [vmem:[%s2001_s0 + $0x10] sm:$0xff] }
  0xae   :  { %v636_v34 = vmul.f32 %v632_v49, %v1218_v7  ;;  %v604_v35 = vadd.f32 %v600_v12, %v564_v44  ;;  %v605_v1 = vadd.f32 %v601_v19, %v565_v17  ;;  %v1644_v36 = vadd.f32 %v606_v9, %v602_v20  ;;  %v1697_v12 = vld [vmem:[%s2001_s0 + $0x18] sm:$0xff] }
  0xaf   :  { %v637_v5 = vadd.f32 %v633_v22, %v628_v18  ;;  %v1646_v37 = vadd.f32 %v606_v9, %v603_v60  ;;  %v638_v2 = vadd.f32 %v634_v24, %v629_v23  ;;  %v641_v6 = vstv %s1611_s10  ;;  %v1705_v22 = vld [vmem:[%s2001_s0 + $0x20] sm:$0xff]  ;;  %v1717_v24 = vld [vmem:[%s2001_s0 + $0x30] sm:$0xff]  ;;  %s1968_s10 = sld [smem:[#allocation10 + $0x2]] }
  0xb0   :  { %v650_v43 = vstv %s1613_s11  ;;  %v639_v26 = vadd.f32 %v635_v25, %v630_v0  ;;  %v642_v3 = vmul.f32 %v641_v6, %v1227_v14  ;;  %v643_v7 = vmul.f32 %v641_v6, %v1232_v15  ;;  %s1005_s11 = sld [smem:[#allocation10 + $0x3]] }
  0xb1   :  { %v644_v45 = vmul.f32 %v641_v6, %v1237_v16  ;;  %v346_v50 = vrot.slane %v1638_v29, 2  ;;  %v611_v51 = vsel %vm336_vm0, %v1644_v36, 0.0  ;;  %v612_v54 = vsel %vm336_vm0, %v1646_v37, 0.0 }
  0xb2   :  { %v640_v61 = vadd.f32 %v636_v34, %v631_v4  ;;  %v645_v10 = vmul.f32 %v641_v6, %v1246_v21  ;;  %v646_v11 = vadd.f32 %v642_v3, %v637_v5  ;;  %v651_v62 = vmul.f32 %v650_v43, %v1258_v31  ;;  %v1677_v21 = vld [vmem:[%s2001_s0] sm:$0xff]  ;;  %v1727_v4 = vld [vmem:[%s2001_s0 + $0x38] sm:$0xff] }
  0xb3   :  { %v663_v14 = vstv %s1625_s12  ;;  %v521_v15 = vrot.slane %v1640_v30, 4  ;;  %v1666_v63 = vadd.f32 %v606_v9, %v604_v35  ;;  %v647_v16 = vadd.f32 %v643_v7, %v638_v2  ;;  %s1006_s12 = sld [smem:[#allocation10 + $0x4]] }
  0xb4   :  { %v652_v28 = vmul.f32 %v650_v43, %v1263_v32  ;;  %v1669_v40 = vadd.f32 %v606_v9, %v605_v1  ;;  %v1671_v41 = vadd.f32 %v612_v54, %v611_v51  ;;  %v648_v56 = vadd.f32 %v644_v45, %v639_v26  ;;  %v1711_v9 = vld [vmem:[%s2001_s0 + $0x28] sm:$0xff]  ;;  %v1747_v54 = vld [vmem:[%s2001_s0 + $0x50] sm:$0xff] }
  0xb5   :  { %v653_v55 = vmul.f32 %v650_v43, %v1268_v33  ;;  %v664_v59 = vmul.f32 %v1677_v21, %v663_v14  ;;  %v665_v58 = vmul.f32 %v1683_v8, %v663_v14  ;;  %v666_v13 = vmul.f32 %v1689_v57, %v663_v14  ;;  %v1741_v45 = vld [vmem:[%s2001_s0 + $0x48] sm:$0xff] }
  0xb6   :  { %v668_v44 = vstv %s1635_s13  ;;  %v649_v17 = vadd.f32 %v645_v10, %v640_v61  ;;  %v654_v18 = vmul.f32 %v650_v43, %v1278_v38  ;;  %v655_v49 = vadd.f32 %v651_v62, %v646_v11  ;;  %v1735_v43 = vld [vmem:[%s2001_s0 + $0x40] sm:$0xff]  ;;  %v1753_v10 = vld [vmem:[%s2001_s0 + $0x58] sm:$0xff]  ;;  %s1007_s13 = sld [smem:[#allocation10 + $0x5]] }
  0xb7   :  { %v667_v19 = vmul.f32 %v1697_v12, %v663_v14  ;;  %v656_v20 = vadd.f32 %v652_v28, %v647_v16  ;;  %v669_v60 = vmul.f32 %v1705_v22, %v668_v44  ;;  %v670_v23 = vmul.f32 %v1711_v9, %v668_v44 }
  0xb8   :  { %v671_v0 = vmul.f32 %v1717_v24, %v668_v44  ;;  %v657_v25 = vadd.f32 %v653_v55, %v648_v56  ;;  %v672_v34 = vmul.f32 %v1727_v4, %v668_v44  ;;  %v677_v35 = vstv %s1650_s1  ;;  %s1765_s1 = sld [smem:[#allocation7 + $0x2]] }
  0xb9   :  { %v686_v1 = vstv %s1652_s3  ;;  %v673_v5 = vadd.f32 %v669_v60, %v664_v59  ;;  %v674_v2 = vadd.f32 %v670_v23, %v665_v58  ;;  %v678_v26 = vmul.f32 %v1735_v43, %v677_v35  ;;  %s1767_s3 = sld [smem:[#allocation7 + $0x3]] }
  0xba   :  { %v675_v6 = vadd.f32 %v671_v0, %v666_v13  ;;  %v658_v3 = vadd.f32 %v654_v18, %v649_v17  ;;  %v676_v7 = vadd.f32 %v672_v34, %v667_v19  ;;  %v679_v51 = vmul.f32 %v1741_v45, %v677_v35 }
  0xbb   :  { %v680_v61 = vmul.f32 %v1747_v54, %v677_v35  ;;  %v681_v11 = vmul.f32 %v1753_v10, %v677_v35  ;;  %v682_v62 = vadd.f32 %v678_v26, %v673_v5  ;;  %v687_v14 = vmul.f32 %v686_v1, %v1258_v31 }
  0xbc   :  { %v688_v16 = vmul.f32 %v686_v1, %v1263_v32  ;;  %v614_v28 = vsel %vm336_vm0, %v1666_v63, 0.0  ;;  %v683_v56 = vadd.f32 %v679_v51, %v674_v2  ;;  %v689_v59 = vmul.f32 %v686_v1, %v1268_v33 }
  0xbd   :  { %v684_v55 = vadd.f32 %v680_v61, %v675_v6  ;;  %v659_v58 = vmul.f32 %v655_v49, %v1405_v46  ;;  %v685_v13 = vadd.f32 %v681_v11, %v676_v7  ;;  %v690_v44 = vmul.f32 %v686_v1, %v1278_v38 }
  0xbe   :  { %v691_v17 = vadd.f32 %v687_v14, %v682_v62  ;;  %v660_v31 = vmul.f32 %v656_v20, %v1407_v47  ;;  %v661_v32 = vmul.f32 %v657_v25, %v1414_v52  ;;  %v692_v18 = vadd.f32 %v688_v16, %v683_v56 }
  0xbf   :  { %v693_v19 = vadd.f32 %v689_v59, %v684_v55  ;;  %v662_v33 = vmul.f32 %v658_v3, %v1416_v53  ;;  %v694_v60 = vadd.f32 %v690_v44, %v685_v13  ;;  %v724_v49 = vstv %s1700_s24 }
  0xc0   :  { %v695_v46 = vmul.f32 %v691_v17, %v1556_v27  ;;  %v696_v23 = vmul.f32 %v692_v18, %v1564_v39  ;;  %v703_v0 = vstv %s1722_s29  ;;  %v729_v47 = vstv %s1720_s28  ;;  %s1895_s28 = sld [smem:[#allocation7 + $0xb]]  ;;  %s1897_s29 = sld [smem:[#allocation7 + $0xc]] }
  0xc1   :  { %v697_v38 = vmul.f32 %v693_v19, %v1566_v42  ;;  %v522_v52 = vadd.f32 %v521_v15, %v1640_v30  ;;  %v616_v20 = vsel %vm336_vm0, %v1669_v40, 0.0  ;;  %v698_v25 = vmul.f32 %v694_v60, %v1570_v48  ;;  %v1831_v60 = vld [vmem:[%s2001_s0 + $0x60] sm:$0xff] }
  0xc2   :  { %v699_v53 = vadd.f32 %v695_v46, %v659_v58  ;;  %v700_v34 = vadd.f32 %v696_v23, %v660_v31  ;;  %v725_v27 = vmul.f32 %v1677_v21, %v724_v49  ;;  %v726_v39 = vmul.f32 %v1683_v8, %v724_v49 }
  0xc3   :  { %v701_v35 = vadd.f32 %v697_v38, %v661_v32  ;;  %v615_v42 = vadd.f32 %v614_v28, %v1671_v41  ;;  %v730_v30 = vmul.f32 %v1705_v22, %v729_v47  ;;  %v731_v15 = vmul.f32 %v1711_v9, %v729_v47  ;;  %v1837_v38 = vld [vmem:[%s2001_s0 + $0x68] sm:$0xff] }
  0xc4   :  { %v1787_v1 = vadd.f32 %v703_v0, %v699_v53  ;;  %v702_v48 = vadd.f32 %v698_v25, %v662_v33  ;;  %v1793_v5 = vadd.f32 %v703_v0, %v700_v34  ;;  %v727_v2 = vmul.f32 %v1689_v57, %v724_v49 }
  0xc5   :  { %v728_v6 = vmul.f32 %v1697_v12, %v724_v49  ;;  %v1797_v26 = vadd.f32 %v703_v0, %v701_v35  ;;  %v732_v3 = vmul.f32 %v1717_v24, %v729_v47  ;;  %v733_v7 = vmul.f32 %v1727_v4, %v729_v47 }
  0xc6   :  { %v708_v41 = vsel %vm336_vm0, %v1787_v1, 0.0  ;;  %v523_v51 = vrot.slane %v522_v52, 2  ;;  %v709_v61 = vsel %vm336_vm0, %v1793_v5, 0.0  ;;  %v734_v11 = vadd.f32 %v730_v30, %v725_v27 }
  0xc7   :  { %v735_v62 = vadd.f32 %v731_v15, %v726_v39  ;;  %v710_v14 = vadd.f32 %v709_v61, %v708_v41  ;;  %v711_v16 = vsel %vm336_vm0, %v1797_v26, 0.0  ;;  %v738_v28 = vstv %s1765_s1  ;;  %s1125_s1 = smov [#allocation11]  }
  0xc8   :  { %v747_v56 = vstv %s1767_s3  ;;  %v1813_v55 = vadd.f32 %v616_v20, %v615_v42  ;;  %v1815_v59 = vadd.f32 %v703_v0, %v702_v48  ;;  %v739_v58 = vmul.f32 %v1735_v43, %v738_v28  ;;  %v1847_v20 = vld [vmem:[%s2001_s0 + $0x70] sm:$0xff]  ;;  %v1858_v42 = vld [vmem:[%s2001_s0 + $0x78] sm:$0xff]  ;;  %s1874_s0 = sld [smem:[#allocation7 + $0x9]]  ;;  %s926_s3 = sshll.u32 %s1125_s1, 4  ;;  %s927_s3 = int_to_ptr.vmem [resolvable:$true] %s926_s3 }
  0xc9   :  { %v740_v13 = vmul.f32 %v1741_v45, %v738_v28  ;;  %v736_v44 = vadd.f32 %v732_v3, %v727_v2  ;;  %v737_v17 = vadd.f32 %v733_v7, %v728_v6  ;;  %v741_v31 = vmul.f32 %v1747_v54, %v738_v28  ;;  %p1095_p12 = scmp.lt.s32.totalorder %s927_s3, %s927_s3 }
  0xca   :  { %v742_v32 = vmul.f32 %v1753_v10, %v738_v28  ;;  %v1824_v18 = vadd.f32 %v346_v50, %v1638_v29  ;;  %v712_v19 = vadd.f32 %v711_v16, %v710_v14  ;;  %v713_v33 = vsel %vm336_vm0, %v1815_v59, 0.0 }
  0xcb   :  { %v748_v46 = vmul.f32 %v1831_v60, %v747_v56  ;;  %v743_v49 = vadd.f32 %v739_v58, %v734_v11  ;;  %v744_v23 = vadd.f32 %v740_v13, %v735_v62  ;;  %v749_v29 = vmul.f32 %v1837_v38, %v747_v56 }
  0xcc   :  { %v760_v50 = vstv %s1784_s14  ;;  %v1841_v0 = vadd.f32 %v523_v51, %v522_v52  ;;  %v618_v47 = vrot.slane %v1813_v55, 4  ;;  %v750_v25 = vmul.f32 %v1847_v20, %v747_v56  ;;  %s1090_s14 = scalar_lea.vmem %s927_s3, 16 }
  0xcd   :  { %v765_v53 = vstv %s1791_s15  ;;  %v745_v34 = vadd.f32 %v741_v31, %v736_v44  ;;  %v746_v35 = vadd.f32 %v742_v32, %v737_v17  ;;  %v761_v27 = vmul.f32 %v1677_v21, %v760_v50  ;;  %p1091_p11 = scmp.ne.s32.totalorder %s927_s3, %s1090_s14  ;;  %s1094_s15 = scalar_lea.vmem %s927_s3, 32 }
  0xce   :  { %v762_v39 = vmul.f32 %v1683_v8, %v760_v50  ;;  %v1853_v52 = vadd.f32 %v713_v33, %v712_v19  ;;  %v751_v30 = vmul.f32 %v1858_v42, %v747_v56  ;;  %v763_v15 = vmul.f32 %v1689_v57, %v760_v50  ;;  %p1096_p13 = scmp.lt.s32.totalorder %s1094_s15, %s1090_s14 }
  0xcf   :  { %v764_v48 = vmul.f32 %v1697_v12, %v760_v50  ;;  %v752_v2 = vadd.f32 %v748_v46, %v743_v49  ;;  %v753_v6 = vadd.f32 %v749_v29, %v744_v23  ;;  %v766_v41 = vmul.f32 %v1705_v22, %v765_v53 }
  0xd0   :  { %v767_v3 = vmul.f32 %v1711_v9, %v765_v53  ;;  %v768_v7 = vmul.f32 %v1717_v24, %v765_v53  ;;  %v769_v51 = vmul.f32 %v1727_v4, %v765_v53  ;;  %v774_v61 = vstv %s1809_s16  ;;  %p1097_p0 = por %p1096_p13, %p1095_p12 }
  0xd1   :  { %v783_v11 = vstv %s1811_s17  ;;  %v754_v62 = vadd.f32 %v750_v25, %v745_v34  ;;  %v770_v14 = vadd.f32 %v766_v41, %v761_v27  ;;  %v775_v28 = vmul.f32 %v1735_v43, %v774_v61 }
  0xd2   :  { %v771_v16 = vadd.f32 %v767_v3, %v762_v39  ;;  %v772_v56 = vadd.f32 %v768_v7, %v763_v15  ;;  %v773_v58 = vadd.f32 %v769_v51, %v764_v48  ;;  %v776_v13 = vmul.f32 %v1741_v45, %v774_v61  ;;  %p1098_p1 = pnand %p1097_p0, %p1091_p11 }
  0xd3   :  { %v777_v44 = vmul.f32 %v1747_v54, %v774_v61  ;;  %v755_v17 = vadd.f32 %v751_v30, %v746_v35  ;;  %v778_v31 = vmul.f32 %v1753_v10, %v774_v61  ;;  %v779_v32 = vadd.f32 %v775_v28, %v770_v14 }
  0xd4   :  { %v784_v19 = vmul.f32 %v1831_v60, %v783_v11  ;;  %v780_v33 = vadd.f32 %v776_v13, %v771_v16  ;;  %v785_v49 = vmul.f32 %v1837_v38, %v783_v11  ;;  %v786_v23 = vmul.f32 %v1847_v20, %v783_v11 }
  0xd5   :  { %v781_v46 = vadd.f32 %v777_v44, %v772_v56  ;;  %v756_v29 = vmul.f32 %v752_v2, %v1644_v36  ;;  %v782_v50 = vadd.f32 %v778_v31, %v773_v58  ;;  %v787_v25 = vmul.f32 %v1858_v42, %v783_v11 }
  0xd6   :  { %v788_v53 = vadd.f32 %v784_v19, %v779_v32  ;;  %v757_v34 = vmul.f32 %v753_v6, %v1646_v37  ;;  %v758_v35 = vmul.f32 %v754_v62, %v1666_v63  ;;  %v789_v27 = vadd.f32 %v785_v49, %v780_v33 }
  0xd7   :  { %v790_v39 = vadd.f32 %v786_v23, %v781_v46  ;;  %v759_v30 = vmul.f32 %v755_v17, %v1669_v40  ;;  %v791_v15 = vadd.f32 %v787_v25, %v782_v50  ;;  %v821_v2 = vstv %s1863_s20 }
  0xd8   :  { %v792_v48 = vmul.f32 %v788_v53, %v1787_v1  ;;  %v619_v41 = vadd.f32 %v618_v47, %v1813_v55  ;;  %v793_v3 = vmul.f32 %v789_v27, %v1793_v5  ;;  %v800_v6 = vstv %s1867_s26 }
  0xd9   :  { %v794_v7 = vmul.f32 %v790_v39, %v1797_v26  ;;  %v715_v51 = vrot.slane %v1853_v52, 4  ;;  %v795_v61 = vmul.f32 %v791_v15, %v1815_v59  ;;  %v822_v62 = vmul.f32 %v1677_v21, %v821_v2 }
  0xda   :  { %v796_v11 = vadd.f32 %v792_v48, %v756_v29  ;;  %v797_v14 = vadd.f32 %v793_v3, %v757_v34  ;;  %v823_v55 = vmul.f32 %v1683_v8, %v821_v2  ;;  %v826_v47 = vstv %s1874_s0 }
  0xdb   :  { %v798_v16 = vadd.f32 %v794_v7, %v758_v35  ;;  %v799_v28 = vadd.f32 %v795_v61, %v759_v30  ;;  %v824_v58 = vmul.f32 %v1689_v57, %v821_v2  ;;  %v827_v13 = vmul.f32 %v1705_v22, %v826_v47 }
  0xdc   :  { %v801_v56 = vadd.f32 %v800_v6, %v796_v11  ;;  %v802_v44 = vadd.f32 %v800_v6, %v797_v14  ;;  %v828_v31 = vmul.f32 %v1711_v9, %v826_v47  ;;  %v829_v32 = vmul.f32 %v1717_v24, %v826_v47 }
  0xdd   :  { %v803_v17 = vadd.f32 %v800_v6, %v798_v16  ;;  %v620_v19 = vrot.slane %v619_v41, 2  ;;  %v1911_v33 = vadd.f32 %v715_v51, %v1853_v52  ;;  %v804_v46 = vadd.f32 %v800_v6, %v799_v28 }
  0xde   :  { %v805_v49 = vsel %vm336_vm0, %v801_v56, 0.0  ;;  %v806_v23 = vsel %vm336_vm0, %v802_v44, 0.0  ;;  %v825_v50 = vmul.f32 %v1697_v12, %v821_v2  ;;  %v830_v25 = vmul.f32 %v1727_v4, %v826_v47 }
  0xdf   :  { %v808_v29 = vsel %vm336_vm0, %v803_v17, 0.0  ;;  %v807_v53 = vadd.f32 %v806_v23, %v805_v49  ;;  %v831_v34 = vadd.f32 %v827_v13, %v822_v62  ;;  %v832_v35 = vadd.f32 %v828_v31, %v823_v55 }
  0xe0   :  { %v835_v27 = vstv %s1886_s27  ;;  %v810_v52 = vsel %vm336_vm0, %v804_v46, 0.0  ;;  %v833_v39 = vadd.f32 %v829_v32, %v824_v58  ;;  %v844_v3 = vstv %s1895_s28 }
  0xe1   :  { %v836_v30 = vmul.f32 %v1735_v43, %v835_v27  ;;  %v837_v15 = vmul.f32 %v1741_v45, %v835_v27  ;;  %v809_v48 = vadd.f32 %v808_v29, %v807_v53  ;;  %v838_v2 = vmul.f32 %v1747_v54, %v835_v27 }
  0xe2   :  { %v857_v7 = vstv %s1897_s29  ;;  %v348_v6 = vrot.slane %v1824_v18, 1  ;;  %v525_v51 = vrot.slane %v1841_v0, 1  ;;  %v834_v61 = vadd.f32 %v830_v25, %v825_v50 }
  0xe3   :  { %v839_v11 = vmul.f32 %v1753_v10, %v835_v27  ;;  %v811_v62 = vadd.f32 %v810_v52, %v809_v48  ;;  %v840_v14 = vadd.f32 %v836_v30, %v831_v34  ;;  %v845_v16 = vmul.f32 %v1831_v60, %v844_v3 }
  0xe4   :  { %v862_v55 = vstv %s1904_s2  ;;  %v1934_v47 = vadd.f32 %v620_v19, %v619_v41  ;;  %v841_v28 = vadd.f32 %v837_v15, %v832_v35  ;;  %v846_v56 = vmul.f32 %v1837_v38, %v844_v3 }
  0xe5   :  { %v858_v58 = vmul.f32 %v1677_v21, %v857_v7  ;;  %v717_v13 = vrot.slane %v1911_v33, 2  ;;  %v842_v44 = vadd.f32 %v838_v2, %v833_v39  ;;  %v847_v17 = vmul.f32 %v1847_v20, %v844_v3 }
  0xe6   :  { %v859_v31 = vmul.f32 %v1683_v8, %v857_v7  ;;  %v860_v32 = vmul.f32 %v1689_v57, %v857_v7  ;;  %v861_v46 = vmul.f32 %v1697_v12, %v857_v7  ;;  %v863_v41 = vmul.f32 %v1705_v22, %v862_v55 }
  0xe7   :  { %v864_v19 = vmul.f32 %v1711_v9, %v862_v55  ;;  %v812_v49 = vrot.slane %v811_v62, 4  ;;  %v843_v23 = vadd.f32 %v839_v11, %v834_v61  ;;  %v848_v21 = vmul.f32 %v1858_v42, %v844_v3 }
  0xe8   :  { %v849_v29 = vadd.f32 %v845_v16, %v840_v14  ;;  %v850_v50 = vadd.f32 %v846_v56, %v841_v28  ;;  %v865_v8 = vmul.f32 %v1717_v24, %v862_v55  ;;  %v866_v57 = vmul.f32 %v1727_v4, %v862_v55 }
  0xe9   :  { %v867_v25 = vadd.f32 %v863_v41, %v858_v58  ;;  %v851_v12 = vadd.f32 %v847_v17, %v842_v44  ;;  %v868_v22 = vadd.f32 %v864_v19, %v859_v31  ;;  %v871_v9 = vstv %s1922_s4 }
  0xea   :  { %v880_v53 = vstv %s1924_s30  ;;  %v869_v34 = vadd.f32 %v865_v8, %v860_v32  ;;  %v870_v35 = vadd.f32 %v866_v57, %v861_v46  ;;  %v872_v27 = vmul.f32 %v1735_v43, %v871_v9 }
  0xeb   :  { %v873_v52 = vmul.f32 %v1741_v45, %v871_v9  ;;  %v852_v39 = vadd.f32 %v848_v21, %v843_v23  ;;  %v874_v24 = vmul.f32 %v1747_v54, %v871_v9  ;;  %v875_v4 = vmul.f32 %v1753_v10, %v871_v9 }
  0xec   :  { %v881_v30 = vmul.f32 %v1831_v60, %v880_v53  ;;  %v876_v15 = vadd.f32 %v872_v27, %v867_v25  ;;  %v882_v2 = vmul.f32 %v1837_v38, %v880_v53  ;;  %v883_v3 = vmul.f32 %v1847_v20, %v880_v53 }
  0xed   :  { %v877_v48 = vadd.f32 %v873_v52, %v868_v22  ;;  %v813_v7 = vadd.f32 %v812_v49, %v811_v62  ;;  %v878_v61 = vadd.f32 %v874_v24, %v869_v34  ;;  %v879_v43 = vadd.f32 %v875_v4, %v870_v35 }
  0xee   :  { %v884_v45 = vmul.f32 %v1858_v42, %v880_v53  ;;  %v853_v11 = vmul.f32 %v849_v29, %v1644_v36  ;;  %v854_v54 = vmul.f32 %v850_v50, %v1646_v37  ;;  %v885_v10 = vadd.f32 %v881_v30, %v876_v15 }
  0xef   :  { %v886_v60 = vadd.f32 %v882_v2, %v877_v48  ;;  %v855_v14 = vmul.f32 %v851_v12, %v1666_v63  ;;  %v856_v38 = vmul.f32 %v852_v39, %v1669_v40  ;;  %v887_v16 = vadd.f32 %v883_v3, %v878_v61 }
  0xf0   :  { %v888_v55 = vadd.f32 %v884_v45, %v879_v43  ;;  %v349_v20 = vadd.f32 %v348_v6, %v1824_v18  ;;  %v350_v62 = vstv %s1946_s7  ;;  %v889_v42 = vmul.f32 %v885_v10, %v1787_v1 }
  0xf1   :  { %v890_v36 = vmul.f32 %v886_v60, %v1793_v5  ;;  %v527_v28 = vstv %s1952_s9  ;;  %v891_v37 = vmul.f32 %v887_v16, %v1797_v26  ;;  %v897_v58 = vstv %s1950_s8 }
  0xf2   :  { %v892_v56 = vmul.f32 %v888_v55, %v1815_v59  ;;  %v526_v63 = vadd.f32 %v525_v51, %v1841_v0  ;;  %v622_v40 = vrot.slane %v1934_v47, 1  ;;  %v893_v44 = vadd.f32 %v889_v42, %v853_v11 }
  0xf3   :  { %v894_v17 = vadd.f32 %v890_v36, %v854_v54  ;;  %v718_v18 = vadd.f32 %v717_v13, %v1911_v33  ;;  %v814_v6 = vrot.slane %v813_v7, 2  ;;  %v895_v1 = vadd.f32 %v891_v37, %v855_v14 }
  0xf4   :  { %v896_v31 = vadd.f32 %v892_v56, %v856_v38  ;;  %v898_v5 = vadd.f32 %v897_v58, %v893_v44  ;;  %v351_v32 = vmul.f32 %v350_v62, %v349_v20  ;;  %v528_v41 = vmul.f32 %v527_v28, %v526_v63 }
  0xf5   :  { %v899_v26 = vadd.f32 %v897_v58, %v894_v17  ;;  %v900_v59 = vadd.f32 %v897_v58, %v895_v1  ;;  %v623_v19 = vadd.f32 %v622_v40, %v1934_v47  ;;  %v719_v49 = vrot.slane %v718_v18, 1 }
  0xf6   :  { %v901_v46 = vadd.f32 %v897_v58, %v896_v31  ;;  %v902_v0 = vsel %vm336_vm0, %v898_v5, 0.0  ;;  %v815_v23 = vadd.f32 %v814_v6, %v813_v7  ;;  %v624_v21 = vstv %s1968_s10 }
  0xf7   :  { %v903_v51 = vsel %vm336_vm0, %v899_v26, 0.0  ;;  %v905_v13 = vsel %vm336_vm0, %v900_v59, 0.0  ;;  %v529_v8 = vadd.f32 %v528_v41, %v351_v32  ;;  %v625_v57 = vmul.f32 %v624_v21, %v623_v19 }
  0xf8   :  { %v904_v33 = vadd.f32 %v903_v51, %v902_v0  ;;  %v907_v29 = vsel %vm336_vm0, %v901_v46, 0.0  ;;  %v720_v25 = vadd.f32 %v719_v49, %v718_v18  ;;  %v816_v12 = vrot.slane %v815_v23, 1 }
  0xf9   :  { %v721_v47 = vstv %s1005_s11  ;;  %v626_v53 = vadd.f32 %v625_v57, %v529_v8  ;;  %v818_v52 = vstv %s1006_s12  ;;  %v915_v48 = vstv %s1007_s13 }
  0xfa   :  { %v906_v50 = vadd.f32 %v905_v13, %v904_v33  ;;  %v722_v34 = vmul.f32 %v721_v47, %v720_v25  ;;  %v817_v35 = vadd.f32 %v816_v12, %v815_v23 }
  0xfc   :  { %v908_v22 = vadd.f32 %v907_v29, %v906_v50  ;;  %v723_v24 = vadd.f32 %v722_v34, %v626_v53  ;;  %v819_v4 = vmul.f32 %v818_v52, %v817_v35 }
  0xfe   :  { %v909_v9 = vrot.slane %v908_v22, 4  ;;  %v820_v2 = vadd.f32 %v819_v4, %v723_v24 }
 0x100   :  { %v910_v27 = vadd.f32 %v909_v9, %v908_v22 }
 0x102   :  { %v911_v39 = vrot.slane %v910_v27, 2 }
 0x104   :  { %v912_v30 = vadd.f32 %v911_v39, %v910_v27 }
 0x106   :  { %v913_v15 = vrot.slane %v912_v30, 1 }
 0x108   :  { %v914_v3 = vadd.f32 %v913_v15, %v912_v30 }
 0x10a   :  { %v916_v7 = vmul.f32 %v915_v48, %v914_v3 }
 0x10c   :  { %v917_v61 = vadd.f32 %v916_v7, %v820_v2 }
 0x10e   :  { %919 = vst.msk [vmem:[#allocation11] sm:$0x1] %vm918_vm1, %v917_v61 }
 0x10f   :  { %1101 = shalt.err (!%p1098_p1)
}
 0x110   :  { %s1102_s18 = scalar_lea.hbm %s2007_s6, 16 }
 0x111   :  { %p1103_p2 = scmp.ne.s32.totalorder %s2007_s6, %s1102_s18  ;;  %p1106_p3 = scmp.lt.u32.totalorder %s1102_s18, %s2007_s6 }
 0x113   :  { %p1108_p4 = pnand %p1106_p3, %p1103_p2 }
 0x115   :  { %1111 = shalt.err (!%p1108_p4)
}
 0x116   :  { %929 = dma.vmem_to_hbm [thread:$0]  %s927_s3, 16, %s2007_s6, [#allocation3]  }
 0x117   :  { %1118 = dma.done.wait [#allocation3], 16  }
 0x118   :  { %1119 = vsyncadd [#allocation3], 4294967280 }
 0x119   :  { %933 = vsyncpa [#allocation3], 1 }
 0x11a   :  { %934 = vsyncpa [#allocation4], 1 }
 0x11b   :  { %935 = vsyncpa [#allocation6], 1 }
 0x11c   :  { %936 = vsyncpa [#allocation9], 1 }

</bundles_post_ra>
